<compile_context>
chip_gen: v7x
topology: tpu7x:2x2x1
jax: 0.10.0
libtpu: 0.0.40
codegen_flags: <defaults>
</compile_context>

<pallas_src>
import jax
import jax.numpy as jnp
from jax import lax
from jax.experimental import pallas as pl
from jax.experimental.pallas import tpu as pltpu


def attention_kernel(x_ref, wt_ref, b_ref, c_ref,
                     m_out, l_out, acc_out,
                     m_sc, l_sc, acc_sc):
    # x_ref : (1, TS, D)  compute dtype (bf16 by default)
    # wt_ref: (D, D)      compute dtype, already transposed (in x out)
    # b_ref : (1, D) f32 ; c_ref: (1, D) f32
    # outputs (flash partials for this (chunk, batch), written once at the
    # last sequence tile of the chunk):
    #   m_out (1,1,1)  l_out (1,1,1)  acc_out (1,1,D)
    # scratch persisting across the seq-tile axis:
    #   m_sc (1,1)  l_sc (1,1)  acc_sc (1,D)  -- all f32
    s_idx = pl.program_id(2)

    @pl.when(s_idx == 0)
    def _init():
        m_sc[...] = jnp.full_like(m_sc, -jnp.inf)
        l_sc[...] = jnp.zeros_like(l_sc)
        acc_sc[...] = jnp.zeros_like(acc_sc)

    x = x_ref[0]          # (TS, D) compute dtype
    wt = wt_ref[...]      # (D, D)  compute dtype (= W.T)
    b = b_ref[...]        # (1, D)  f32
    c = c_ref[...]        # (1, D)  f32

    # h = tanh(x @ W.T + b): bf16 operands on the MXU, f32 accumulation.
    # W.T is materialized in the wrapper, so this is the canonical row x col
    # contraction -- no per-step transposed copy of W.
    h = jnp.tanh(
        lax.dot_general(
            x, wt,
            dimension_numbers=(((1,), (0,)), ((), ())),
            preferred_element_type=jnp.float32,
        )
        + b
    )  # (TS, D) f32

    # scores = h @ context_vector: VPU multiply + lane reduction (all f32).
    scores = jnp.sum(h * c, axis=1, keepdims=True)  # (TS, 1)

    # Online (flash-style) softmax over the sequence, normalization deferred.
    m_prev = m_sc[...]                                               # (1, 1)
    m_new = jnp.maximum(m_prev, jnp.max(scores, axis=0, keepdims=True))
    alpha = jnp.exp(m_prev - m_new)                                  # rescale old partials
    e = jnp.exp(scores - m_new)                                      # (TS, 1) unnormalized

    l_sc[...] = alpha * l_sc[...] + jnp.sum(e, axis=0, keepdims=True)
    acc_sc[...] = alpha * acc_sc[...] + jnp.sum(e * h, axis=0, keepdims=True)
    m_sc[...] = m_new

    @pl.when(s_idx == pl.num_programs(2) - 1)
    def _finalize():
        m_out[0] = m_sc[...]
        l_out[0] = l_sc[...]
        acc_out[0] = acc_sc[...]


def _vmem_budget_bytes() -> int:
    """Generation-aware scoped-VMEM budget: ~48 MiB on v7x (64 MiB physical),
    up to 96 MiB on v5e/v6e (128 MiB physical)."""
    cap = None
    try:
        cap = getattr(pltpu.get_tpu_info(), "vmem_capacity_bytes", None)
    except Exception:
        cap = None
    if not cap:
        cap = 64 * 1024 * 1024          # conservative: assume v7x-sized VMEM
    budget = int(cap) - 16 * 1024 * 1024  # headroom for compiler scratch
    return int(min(max(budget, 32 * 1024 * 1024), 96 * 1024 * 1024))


def _pick_seq_block(seq_len: int, d: int, itemsize: int, budget: int) -> int:
    """Largest tile whose double-buffered x stream + resident W fits well inside
    the scoped-VMEM budget.  Bigger tiles amortize the ~0.35us per-grid-step
    overhead and keep the HBM DMAs large."""
    usable = budget // 2
    for cand in (2048, 1024, 512, 256, 128):
        if seq_len % cand == 0 and (2 * cand * d + 2 * d * d) * itemsize <= usable:
            return cand
    return seq_len  # tiny / irregular sequence: single tile over the full sequence


def attention_module_batched(x, w, b, c, *, block_s=None, use_bf16=True):
    """x: (B, S, D); w: (D, D) (PyTorch Linear layout: out x in); b, c: (D,).
    Returns (B, D) float32."""
    B, S, D = x.shape
    compute_dtype = jnp.bfloat16 if use_bf16 else jnp.float32
    budget = _vmem_budget_bytes()
    if block_s is None:
        block_s = _pick_seq_block(S, D, jnp.dtype(compute_dtype).itemsize, budget)
    assert S % block_s == 0, (S, block_s)
    nt = S // block_s

    # Single sequence: split the softmax reduction into 2 parallel chunks so
    # both v7x TensorCores get work (a tiny flash-combine merges the partials).
    nc = 2 if (B == 1 and nt >= 2 and nt % 2 == 0) else 1
    chunk = nt // nc

    x_c = x.astype(compute_dtype)
    wt = jnp.transpose(w).astype(compute_dtype)     # one-time transpose: (in, out)
    b2 = b.reshape(1, D).astype(jnp.float32)
    c2 = c.reshape(1, D).astype(jnp.float32)

    grid = (nc, B, chunk)
    stat_spec = pl.BlockSpec((1, 1, 1), lambda nci, bb, ss: (nci * B + bb, 0, 0))
    acc_spec = pl.BlockSpec((1, 1, D), lambda nci, bb, ss: (nci * B + bb, 0, 0))

    m_p, l_p, acc_p = pl.pallas_call(
        attention_kernel,
        out_shape=(
            jax.ShapeDtypeStruct((nc * B, 1, 1), jnp.float32),
            jax.ShapeDtypeStruct((nc * B, 1, 1), jnp.float32),
            jax.ShapeDtypeStruct((nc * B, 1, D), jnp.float32),
        ),
        grid_spec=pltpu.PrefetchScalarGridSpec(
            num_scalar_prefetch=0,
            grid=grid,
            in_specs=[
                # x streamed in (1, block_s, D) bf16 tiles (half the HBM bytes)
                pl.BlockSpec((1, block_s, D),
                             lambda nci, bb, ss: (bb, nci * chunk + ss, 0)),
                pl.BlockSpec((D, D), lambda nci, bb, ss: (0, 0)),   # W.T (VMEM resident)
                pl.BlockSpec((1, D), lambda nci, bb, ss: (0, 0)),   # bias (resident)
                pl.BlockSpec((1, D), lambda nci, bb, ss: (0, 0)),   # context vec (resident)
            ],
            out_specs=(stat_spec, stat_spec, acc_spec),
            scratch_shapes=[
                pltpu.VMEM((1, 1), jnp.float32),   # running max
                pltpu.VMEM((1, 1), jnp.float32),   # running denominator
                pltpu.VMEM((1, D), jnp.float32),   # unnormalized attended accumulator
            ],
        ),
        compiler_params=pltpu.CompilerParams(
            dimension_semantics=("parallel", "parallel", "arbitrary"),
            vmem_limit_bytes=budget,
        ),
    )(x_c, wt, b2, c2)

    # Flash-style combine of per-chunk partials (exact f32; trivial for nc == 1).
    m_p = m_p.reshape(nc, B)          # (nc, B)
    l_p = l_p.reshape(nc, B)          # (nc, B)
    acc_p = acc_p.reshape(nc, B, D)   # (nc, B, D)
    m = jnp.max(m_p, axis=0)                              # (B,)
    scale = jnp.exp(m_p - m[None, :])                     # (nc, B)
    l = jnp.sum(scale * l_p, axis=0)                      # (B,)
    acc = jnp.sum(scale[:, :, None] * acc_p, axis=0)      # (B, D)
    return acc / l[:, None]


def attention_module(x, w, b, c, **kwargs):
    """Exactly the PyTorch forward: x (S, D) -> (D,)."""
    return attention_module_batched(x[None], w, b, c, **kwargs)[0]


def attention_module_ref(x, w, b, c, compute_dtype=jnp.float32):
    xc = x.astype(compute_dtype).astype(jnp.float32)
    wc = w.astype(compute_dtype).astype(jnp.float32)
    h = jnp.tanh(xc @ wc.T + b)
    scores = h @ c
    attn = jax.nn.softmax(scores, axis=0)
    return attn @ h


if __name__ == "__main__":
    key = jax.random.PRNGKey(0)
    kx, kw, kb, kc, kx2, kw2, kb2, kc2 = jax.random.split(key, 8)

    # Batched, lane-dense case (bf16 streaming path): grid = (1, 2 batch, seq tiles).
    B, S, D = 2, 256, 128
    x = jax.random.normal(kx, (B, S, D), dtype=jnp.float32)
    w = jax.random.normal(kw, (D, D), dtype=jnp.float32) * (1.0 / (D ** 0.5))
    b = jax.random.normal(kb, (D,), dtype=jnp.float32) * 0.1
    c = jax.random.normal(kc, (D,), dtype=jnp.float32) * 0.1

    out = jax.block_until_ready(attention_module_batched(x, w, b, c))
    ref = jax.vmap(lambda xi: attention_module_ref(xi, w, b, c, jnp.bfloat16))(x)
    assert out.shape == (B, D)
    assert jnp.allclose(out, ref, atol=2e-3, rtol=2e-3), "batched bf16 mismatch vs reference"

    # Single sequence with an explicit smaller tile -> exercises the 2-chunk
    # core-split + flash-combine path (grid = (2, 1, 1)).
    out1 = jax.block_until_ready(attention_module(x[0], w, b, c, block_s=128))
    ref1 = attention_module_ref(x[0], w, b, c, jnp.bfloat16)
    assert out1.shape == (D,)
    assert jnp.allclose(out1, ref1, atol=2e-3, rtol=2e-3), "core-split mismatch vs reference"

    # Shape implied directly by the PyTorch forward: seq=8, output_dim=32,
    # exact f32 mode (use_bf16=False) against the f32 reference.
    S2, D2 = 8, 32
    x2 = jax.random.normal(kx2, (S2, D2), dtype=jnp.float32)
    w2 = jax.random.normal(kw2, (D2, D2), dtype=jnp.float32) * 0.1
    b2 = jax.random.normal(kb2, (D2,), dtype=jnp.float32) * 0.1
    c2 = jax.random.normal(kc2, (D2,), dtype=jnp.float32) * 0.1

    out2 = jax.block_until_ready(attention_module(x2, w2, b2, c2, use_bf16=False))
    ref2 = attention_module_ref(x2, w2, b2, c2)
    assert out2.shape == (D2,)
    assert jnp.allclose(out2, ref2, atol=1e-4, rtol=1e-4), "tiny-shape f32 mismatch vs reference"

    print("KERNEL_OK")
</pallas_src>

<mosaic_0001>
module attributes {stable_mosaic.version = 11 : i64} {
  func.func @attention_kernel(%arg0: i32, %arg1: i32, %arg2: i32, %arg3: memref<1x256x128xbf16, #tpu.memory_space<vmem>>, %arg4: memref<128x128xbf16, #tpu.memory_space<vmem>>, %arg5: memref<1x128xf32, #tpu.memory_space<vmem>>, %arg6: memref<1x128xf32, #tpu.memory_space<vmem>>, %arg7: memref<1x1x1xf32, #tpu.memory_space<vmem>>, %arg8: memref<1x1x1xf32, #tpu.memory_space<vmem>>, %arg9: memref<1x1x128xf32, #tpu.memory_space<vmem>>, %arg10: memref<1x1xf32, #tpu.memory_space<vmem>>, %arg11: memref<1x1xf32, #tpu.memory_space<vmem>>, %arg12: memref<1x128xf32, #tpu.memory_space<vmem>>) attributes {dimension_semantics = [#tpu.dimension_semantics<parallel>, #tpu.dimension_semantics<parallel>, #tpu.dimension_semantics<arbitrary>], iteration_bounds = array<i64: 1, 2, 1>, scalar_prefetch = 0 : i64, scratch_operands = 3 : i64, tpu.core_type = #tpu.core_type<tc>, window_params = [{transform_indices = @transform_0, window_bounds = array<i64: 1, 256, 128>}, {pipeline_mode = #tpu.pipeline_mode<synchronous>, transform_indices = @transform_1, window_bounds = array<i64: 128, 128>}, {pipeline_mode = #tpu.pipeline_mode<synchronous>, transform_indices = @transform_2, window_bounds = array<i64: 1, 128>}, {pipeline_mode = #tpu.pipeline_mode<synchronous>, transform_indices = @transform_3, window_bounds = array<i64: 1, 128>}, {transform_indices = @transform_4, window_bounds = array<i64: 1, 1, 1>}, {transform_indices = @transform_5, window_bounds = array<i64: 1, 1, 1>}, {transform_indices = @transform_6, window_bounds = array<i64: 1, 1, 128>}]} {
    %c0_i32 = arith.constant 0 : i32
    %0 = arith.cmpi eq, %arg2, %c0_i32 : i32
    %1 = arith.extui %0 : i1 to i32
    %c0_i32_0 = arith.constant 0 : i32
    %2 = arith.cmpi ne, %1, %c0_i32_0 : i32
    scf.if %2 {
      %cst_27 = arith.constant 0xFF800000 : f32
      %44 = vector.broadcast %cst_27 : f32 to vector<1x1xf32>
      %c0_28 = arith.constant 0 : index
      %c0_29 = arith.constant 0 : index
      %45 = vector.load %arg10[%c0_28, %c0_29] : memref<1x1xf32, #tpu.memory_space<vmem>>, vector<1x1xf32>
      tpu.vector_store %arg10[%c0_28, %c0_29], %44 {strides = array<i32>} : memref<1x1xf32, #tpu.memory_space<vmem>>, vector<1x1xf32>,
      %cst_30 = arith.constant 0.000000e+00 : f32
      %46 = vector.broadcast %cst_30 : f32 to vector<1x1xf32>
      %c0_31 = arith.constant 0 : index
      %c0_32 = arith.constant 0 : index
      %47 = vector.load %arg11[%c0_31, %c0_32] : memref<1x1xf32, #tpu.memory_space<vmem>>, vector<1x1xf32>
      tpu.vector_store %arg11[%c0_31, %c0_32], %46 {strides = array<i32>} : memref<1x1xf32, #tpu.memory_space<vmem>>, vector<1x1xf32>,
      %cst_33 = arith.constant 0.000000e+00 : f32
      %48 = vector.broadcast %cst_33 : f32 to vector<1x128xf32>
      %c0_34 = arith.constant 0 : index
      %c0_35 = arith.constant 0 : index
      %49 = vector.load %arg12[%c0_34, %c0_35] : memref<1x128xf32, #tpu.memory_space<vmem>>, vector<1x128xf32>
      tpu.vector_store %arg12[%c0_34, %c0_35], %48 {strides = array<i32>} : memref<1x128xf32, #tpu.memory_space<vmem>>, vector<1x128xf32>,
    } else {
    }
    %c0 = arith.constant 0 : index
    %c0_1 = arith.constant 0 : index
    %c0_2 = arith.constant 0 : index
    %3 = vector.load %arg3[%c0, %c0_1, %c0_2] : memref<1x256x128xbf16, #tpu.memory_space<vmem>>, vector<1x256x128xbf16>
    %4 = vector.shape_cast %3 : vector<1x256x128xbf16> to vector<256x128xbf16>
    %c0_3 = arith.constant 0 : index
    %c0_4 = arith.constant 0 : index
    %5 = vector.load %arg4[%c0_3, %c0_4] : memref<128x128xbf16, #tpu.memory_space<vmem>>, vector<128x128xbf16>
    %c0_5 = arith.constant 0 : index
    %c0_6 = arith.constant 0 : index
    %6 = vector.load %arg5[%c0_5, %c0_6] : memref<1x128xf32, #tpu.memory_space<vmem>>, vector<1x128xf32>
    %c0_7 = arith.constant 0 : index
    %c0_8 = arith.constant 0 : index
    %7 = vector.load %arg6[%c0_7, %c0_8] : memref<1x128xf32, #tpu.memory_space<vmem>>, vector<1x128xf32>
    %cst = arith.constant dense<0.000000e+00> : vector<256x128xf32>
    %8 = tpu.matmul %4, %5, %cst {dimension_numbers = #tpu.dot_dimension_numbers<[1], [0], [0], [1], [0, 0, 1, 1], [], []>} : vector<256x128xbf16>, vector<128x128xbf16>, vector<256x128xf32> -> vector<256x128xf32>
    %9 = vector.broadcast %6 : vector<1x128xf32> to vector<256x128xf32>
    %10 = arith.addf %8, %9 : vector<256x128xf32>
    %11 = math.tanh %10 : vector<256x128xf32>
    %12 = vector.broadcast %7 : vector<1x128xf32> to vector<256x128xf32>
    %13 = arith.mulf %11, %12 : vector<256x128xf32>
    %cst_9 = arith.constant dense<0.000000e+00> : vector<256xf32>
    %14 = vector.multi_reduction <add>, %13, %cst_9 [1] : vector<256x128xf32> to vector<256xf32>
    %15 = vector.shape_cast %14 : vector<256xf32> to vector<256x1xf32>
    %c0_10 = arith.constant 0 : index
    %c0_11 = arith.constant 0 : index
    %16 = vector.load %arg10[%c0_10, %c0_11] : memref<1x1xf32, #tpu.memory_space<vmem>>, vector<1x1xf32>
    %cst_12 = arith.constant dense<0xFF800000> : vector<1xf32>
    %17 = vector.multi_reduction <maximumf>, %15, %cst_12 [0] : vector<256x1xf32> to vector<1xf32>
    %18 = vector.shape_cast %17 : vector<1xf32> to vector<1x1xf32>
    %19 = arith.maximumf %16, %18 : vector<1x1xf32>
    %20 = arith.subf %16, %19 : vector<1x1xf32>
    %21 = math.exp %20 : vector<1x1xf32>
    %22 = vector.broadcast %19 : vector<1x1xf32> to vector<256x1xf32>
    %23 = arith.subf %15, %22 : vector<256x1xf32>
    %24 = math.exp %23 : vector<256x1xf32>
    %c0_13 = arith.constant 0 : index
    %c0_14 = arith.constant 0 : index
    %25 = vector.load %arg11[%c0_13, %c0_14] : memref<1x1xf32, #tpu.memory_space<vmem>>, vector<1x1xf32>
    %26 = arith.mulf %21, %25 : vector<1x1xf32>
    %cst_15 = arith.constant dense<0.000000e+00> : vector<1xf32>
    %27 = vector.multi_reduction <add>, %24, %cst_15 [0] : vector<256x1xf32> to vector<1xf32>
    %28 = vector.shape_cast %27 : vector<1xf32> to vector<1x1xf32>
    %29 = arith.addf %26, %28 : vector<1x1xf32>
    %c0_16 = arith.constant 0 : index
    %c0_17 = arith.constant 0 : index
    %30 = vector.load %arg11[%c0_16, %c0_17] : memref<1x1xf32, #tpu.memory_space<vmem>>, vector<1x1xf32>
    tpu.vector_store %arg11[%c0_16, %c0_17], %29 {strides = array<i32>} : memref<1x1xf32, #tpu.memory_space<vmem>>, vector<1x1xf32>,
    %c0_18 = arith.constant 0 : index
    %c0_19 = arith.constant 0 : index
    %31 = vector.load %arg12[%c0_18, %c0_19] : memref<1x128xf32, #tpu.memory_space<vmem>>, vector<1x128xf32>
    %32 = vector.broadcast %21 : vector<1x1xf32> to vector<1x128xf32>
    %33 = arith.mulf %32, %31 : vector<1x128xf32>
    %34 = vector.broadcast %24 : vector<256x1xf32> to vector<256x128xf32>
    %35 = arith.mulf %34, %11 : vector<256x128xf32>
    %cst_20 = arith.constant dense<0.000000e+00> : vector<128xf32>
    %36 = vector.multi_reduction <add>, %35, %cst_20 [0] : vector<256x128xf32> to vector<128xf32>
    %37 = vector.shape_cast %36 : vector<128xf32> to vector<1x128xf32>
    %38 = arith.addf %33, %37 : vector<1x128xf32>
    %c0_21 = arith.constant 0 : index
    %c0_22 = arith.constant 0 : index
    %39 = vector.load %arg12[%c0_21, %c0_22] : memref<1x128xf32, #tpu.memory_space<vmem>>, vector<1x128xf32>
    tpu.vector_store %arg12[%c0_21, %c0_22], %38 {strides = array<i32>} : memref<1x128xf32, #tpu.memory_space<vmem>>, vector<1x128xf32>,
    %c0_23 = arith.constant 0 : index
    %c0_24 = arith.constant 0 : index
    %40 = vector.load %arg10[%c0_23, %c0_24] : memref<1x1xf32, #tpu.memory_space<vmem>>, vector<1x1xf32>
    tpu.vector_store %arg10[%c0_23, %c0_24], %19 {strides = array<i32>} : memref<1x1xf32, #tpu.memory_space<vmem>>, vector<1x1xf32>,
    %c0_i32_25 = arith.constant 0 : i32
    %41 = arith.cmpi eq, %arg2, %c0_i32_25 : i32
    %42 = arith.extui %41 : i1 to i32
    %c0_i32_26 = arith.constant 0 : i32
    %43 = arith.cmpi ne, %42, %c0_i32_26 : i32
    scf.if %43 {
      %c0_27 = arith.constant 0 : index
      %c0_28 = arith.constant 0 : index
      %44 = vector.load %arg10[%c0_27, %c0_28] : memref<1x1xf32, #tpu.memory_space<vmem>>, vector<1x1xf32>
      %c0_29 = arith.constant 0 : index
      %c0_30 = arith.constant 0 : index
      %c0_31 = arith.constant 0 : index
      %45 = vector.load %arg7[%c0_29, %c0_30, %c0_31] : memref<1x1x1xf32, #tpu.memory_space<vmem>>, vector<1x1x1xf32>
      %46 = vector.shape_cast %45 : vector<1x1x1xf32> to vector<1x1xf32>
      %47 = vector.shape_cast %44 : vector<1x1xf32> to vector<1x1x1xf32>
      tpu.vector_store %arg7[%c0_29, %c0_30, %c0_31], %47 {strides = array<i32>} : memref<1x1x1xf32, #tpu.memory_space<vmem>>, vector<1x1x1xf32>,
      %c0_32 = arith.constant 0 : index
      %c0_33 = arith.constant 0 : index
      %48 = vector.load %arg11[%c0_32, %c0_33] : memref<1x1xf32, #tpu.memory_space<vmem>>, vector<1x1xf32>
      %c0_34 = arith.constant 0 : index
      %c0_35 = arith.constant 0 : index
      %c0_36 = arith.constant 0 : index
      %49 = vector.load %arg8[%c0_34, %c0_35, %c0_36] : memref<1x1x1xf32, #tpu.memory_space<vmem>>, vector<1x1x1xf32>
      %50 = vector.shape_cast %49 : vector<1x1x1xf32> to vector<1x1xf32>
      %51 = vector.shape_cast %48 : vector<1x1xf32> to vector<1x1x1xf32>
      tpu.vector_store %arg8[%c0_34, %c0_35, %c0_36], %51 {strides = array<i32>} : memref<1x1x1xf32, #tpu.memory_space<vmem>>, vector<1x1x1xf32>,
      %c0_37 = arith.constant 0 : index
      %c0_38 = arith.constant 0 : index
      %52 = vector.load %arg12[%c0_37, %c0_38] : memref<1x128xf32, #tpu.memory_space<vmem>>, vector<1x128xf32>
      %c0_39 = arith.constant 0 : index
      %c0_40 = arith.constant 0 : index
      %c0_41 = arith.constant 0 : index
      %53 = vector.load %arg9[%c0_39, %c0_40, %c0_41] : memref<1x1x128xf32, #tpu.memory_space<vmem>>, vector<1x1x128xf32>
      %54 = vector.shape_cast %53 : vector<1x1x128xf32> to vector<1x128xf32>
      %55 = vector.shape_cast %52 : vector<1x128xf32> to vector<1x1x128xf32>
      tpu.vector_store %arg9[%c0_39, %c0_40, %c0_41], %55 {strides = array<i32>} : memref<1x1x128xf32, #tpu.memory_space<vmem>>, vector<1x1x128xf32>,
    } else {
    }
    return
  }
  func.func @transform_0(%arg0: i32, %arg1: i32, %arg2: i32) -> (i32, i32, i32) {
    %c1_i32 = arith.constant 1 : i32
    %0 = arith.muli %arg0, %c1_i32 : i32
    %1 = arith.addi %0, %arg2 : i32
    %c0_i32 = arith.constant 0 : i32
    %c0_i32_0 = arith.constant 0 : i32
    return %arg1, %1, %c0_i32 : i32, i32, i32
  }
  func.func @transform_1(%arg0: i32, %arg1: i32, %arg2: i32) -> (i32, i32) {
    %c0_i32 = arith.constant 0 : i32
    %c0_i32_0 = arith.constant 0 : i32
    %c0_i32_1 = arith.constant 0 : i32
    return %c0_i32, %c0_i32_0 : i32, i32
  }
  func.func @transform_2(%arg0: i32, %arg1: i32, %arg2: i32) -> (i32, i32) {
    %c0_i32 = arith.constant 0 : i32
    %c0_i32_0 = arith.constant 0 : i32
    %c0_i32_1 = arith.constant 0 : i32
    return %c0_i32, %c0_i32_0 : i32, i32
  }
  func.func @transform_3(%arg0: i32, %arg1: i32, %arg2: i32) -> (i32, i32) {
    %c0_i32 = arith.constant 0 : i32
    %c0_i32_0 = arith.constant 0 : i32
    %c0_i32_1 = arith.constant 0 : i32
    return %c0_i32, %c0_i32_0 : i32, i32
  }
  func.func @transform_4(%arg0: i32, %arg1: i32, %arg2: i32) -> (i32, i32, i32) {
    %c2_i32 = arith.constant 2 : i32
    %0 = arith.muli %arg0, %c2_i32 : i32
    %1 = arith.addi %0, %arg1 : i32
    %c0_i32 = arith.constant 0 : i32
    %c0_i32_0 = arith.constant 0 : i32
    %c0_i32_1 = arith.constant 0 : i32
    return %1, %c0_i32, %c0_i32_0 : i32, i32, i32
  }
  func.func @transform_5(%arg0: i32, %arg1: i32, %arg2: i32) -> (i32, i32, i32) {
    %c2_i32 = arith.constant 2 : i32
    %0 = arith.muli %arg0, %c2_i32 : i32
    %1 = arith.addi %0, %arg1 : i32
    %c0_i32 = arith.constant 0 : i32
    %c0_i32_0 = arith.constant 0 : i32
    %c0_i32_1 = arith.constant 0 : i32
    return %1, %c0_i32, %c0_i32_0 : i32, i32, i32
  }
  func.func @transform_6(%arg0: i32, %arg1: i32, %arg2: i32) -> (i32, i32, i32) {
    %c2_i32 = arith.constant 2 : i32
    %0 = arith.muli %arg0, %c2_i32 : i32
    %1 = arith.addi %0, %arg1 : i32
    %c0_i32 = arith.constant 0 : i32
    %c0_i32_0 = arith.constant 0 : i32
    %c0_i32_1 = arith.constant 0 : i32
    return %1, %c0_i32, %c0_i32_0 : i32, i32, i32
  }
}

</mosaic_0001>

<bundles_post_ra>
// kernel: tpu_custom_call.1
= control target key start
LH: loop header
LB: loop body
LE: loop exit
PB: predicated region body
PF: predicated region fallthrough
CT: control target
= control target key end

     0   :  { %12 = vsyncpa [#allocation6], 0  ;;  %s2760_s0 = inlined_call_operand.hbm [shape: bf16[2,256,128], index: 0, kind: input, shape index: {}]   ;;  %s2761_s1 = inlined_call_operand.hbm [shape: bf16[128,128], index: 1, kind: input, shape index: {}]   ;;  %s2762_s2 = inlined_call_operand.vmem [shape: f32[1,128], index: 2, kind: input, shape index: {}]   ;;  %s2763_s3 = inlined_call_operand.vmem [shape: f32[1,128], index: 3, kind: input, shape index: {}]   ;;  %s2764_s4 = inlined_call_operand.vmem [shape: f32[2,1,1], index: 4, kind: output, shape index: {0}]   ;;  %s2765_s5 = inlined_call_operand.vmem [shape: f32[2,1,1], index: 5, kind: output, shape index: {1}]   ;;  %s2766_s6 = inlined_call_operand.hbm [shape: f32[2,1,128], index: 6, kind: output, shape index: {2}]  }
   0x1   :  { %14 = vsyncpa [#allocation6 + $0x1], 0 }
   0x2   :  { %15 = vsyncpa [#allocation9], 0 }
   0x3   :  { %16 = vsyncpa [#allocation7], 0 }
   0x4   :  { %18 = vsyncpa [#allocation7 + $0x1], 0  ;;  %s2052_s21 = smov 0   ;;  %s2054_s22 = smov 0  }
   0x5   :  { %s2056_s23 = smov 0   ;;  %s2058_s24 = smov 0  }
   0x6   :  { %s2060_s25 = smov 0   ;;  %s2062_s26 = smov 0  }
   0x7 LB: > { %s1500_s27 = sadd.s32 4294967295, %s2007_s26   ;;  %s1501_s28 = sadd.s32 4294967294, %s2007_s26   ;;  %s2007_s26 = sphi %s2062_s26, %s24_s26   ;;  %s2003_s25 = sphi %s2060_s25, %s2848_s25   ;;  %s1999_s24 = sphi %s2058_s24, %s2847_s24   ;;  %s1995_s23 = sphi %s2056_s23, %s2846_s23   ;;  %s1991_s22 = sphi %s2054_s22, %s2845_s22   ;;  %s1987_s21 = sphi %s2052_s21, %s2844_s21  }
   0x8   : > { %p67_p0 = scmp.ne.s32.totalorder %s1991_s22, %s1987_s21  ;;  %p2086_p1 = scmp.eq.s32.totalorder %s1500_s27, 0 }
   0x9   : > { %p2090_p2 = scmp.eq.s32.totalorder %s1500_s27, 1  ;;  %p224_p3 = scmp.eq.s32.totalorder %s1501_s28, 1 }
   0xa   : > { %s2791_s29 = scalar_select %p2086_p1, 1, 0 }
   0xb   : > { %s2792_s30 = scalar_select %p2090_p2, 1, 0 }
   0xc   : > { %p2096_p4 = por %p2086_p1, %p67_p0  ;;  %p1502_p5 = scmp.ge.s32.totalorder %s2007_s26, 1 }
   0xd   : > { %p2101_p6 = por %p224_p3, %p67_p0  ;;  %p231_p7 = scmp.lt.s32.totalorder %s2007_s26, 3 }
   0xe   : > { %s2793_s7 = scalar_select %p2096_p4, 1, 0 }
   0xf   : > { %s2794_s8 = scalar_select %p2101_p6, 1, 0 }
  0x10   : > { %p2106_p8 = pnand %p1502_p5, %p231_p7  ;;  %s2009_s10 = smov [#allocation8]  }
  0x11   : > { %s243_s11 = sshll.u32 %s2009_s10, 4  ;;  %s39_s13 = sadd.s32 1, %s2003_s25  ;;  %s244_s11 = int_to_ptr.vmem [resolvable:$true] %s243_s11 }
  0x12   : > { %s2795_s9 = scalar_select %p2106_p8, 1, 0 }
  0x13   : > { %p1637_p9 = pneg %p2106_p8  ;;  %s1863_s16 = scalar_lea.hbm %s2761_s1, 1024 }
  0x14   : > { %p1864_p12 = scmp.ne.s32.totalorder %s2761_s1, %s1863_s16  ;;  %p1870_p5 = scmp.lt.u32.totalorder %s1863_s16, %s2761_s1 }
  0x15   : > { %p2115_p11 = pnand %p1637_p9, %p2086_p1 }
  0x17   : > { %p1865_p13 = pneg %p2115_p11 }
  0x19   : > { %p1866_p0 = pnand %p1865_p13, %p1864_p12 }
  0x1b   : > { %p1867_p3 = pneg %p1866_p0 }
  0x1d   : > { %p1872_p7 = pnand %p1870_p5, %p1867_p3 }
  0x1f   : > { %1875 = shalt.err (!%p1872_p7)
}
  0x20   : > { %s1876_s27 = scalar_lea.vmem %s244_s11, 1024  ;;  %p1884_p1 = scmp.lt.s32.totalorder %s244_s11, %s244_s11 }
  0x21   : > { %p1877_p9 = scmp.ne.s32.totalorder %s244_s11, %s1876_s27  ;;  %p1885_p4 = scmp.lt.s32.totalorder %s1876_s27, %s1876_s27 }
  0x23   : > { %p1879_p10 = pnand %p1877_p9, %p1865_p13  ;;  %p1886_p8 = por %p1885_p4, %p1884_p1 }
  0x25   : > { %p1880_p6 = pneg %p1879_p10 }
  0x27   : > { %p1887_p2 = pnand %p1886_p8, %p1880_p6 }
  0x29   : > { %1890 = shalt.err (!%p1887_p2)
}
  0x2a   : > { %s2771_s28 = smov 64   ;;  %s2772_s10 = smov 4  }
  0x2b   : > { %1640 = dma.hbm_to_vmem [thread:$0]  (!%p2115_p11), %s2761_s1, 1024, %s244_s11, [#allocation9], %s2771_s28, %s2771_s28, %s2772_s10  }
  0x2c   : > { %p41_p1 = scmp.ge.s32.totalorder %s39_s13, 2  ;;  %s54_s16 = sadd.s32 1, %s1995_s23 }
  0x2d   : > { %p61_p2 = scmp.ne.s32.totalorder %s1995_s23, %s1991_s22  ;;  %p62_p4 = scmp.eq.s32.totalorder %s2007_s26, 0 }
  0x2e   : > { %s2850_s13 = smov (%p41_p1, %s39_s13), 0  ;;  %p2798_p8 = scmp.ne.s32.totalorder %s2792_s30, 0 }
  0x2f   : > { %p2145_p6 = por %p62_p4, %p61_p2  ;;  %s49_s18 = ssub.s32 %s2003_s25, %s2850_s13 }
  0x30   : > { %p2151_p10 = por %p2798_p8, %p61_p2  ;;  %p1650_p12 = scmp.lt.s32.totalorder %s2007_s26, 2 }
  0x31   : > { %p52_p11 = scmp.eq.s32.totalorder %s49_s18, 0  ;;  %s263_s11 = sand.u32 1, %s1995_s23  }
  0x32   : > { %s1505_s19 = sshll.u32 %s263_s11, 7  ;;  %s1540_s27 = sshll.u32 %s2003_s25, 11 }
  0x33   : > { %s2160_s20 = scalar_select %p52_p11, %s1995_s23, %s54_s16  }
  0x34   : > { %s2166_s28 = scalar_lea.hbm %s2760_s0, %s1540_s27  ;;  %s267_s30 = scalar_lea.vmem [#allocation5], %s1505_s19 }
  0x35   : > { %s277_s10 = sshll.u32 %s267_s30, 4  ;;  %p2172_p13 = pnand %p1650_p12, %p2145_p6  ;;  %s2168_s10 = int_to_ptr.vmem [resolvable:$true] %s277_s10 }
  0x36   : > { %s2176_s16 = scalar_lea.sflag [#allocation6], %s263_s11  ;;  %s1891_s14 = scalar_lea.hbm %s2166_s28, 2048 }
  0x37   : > { %p1892_p0 = scmp.ne.s32.totalorder %s2166_s28, %s1891_s14  ;;  %p1893_p3 = pneg %p2172_p13 }
  0x38   : > { %s1896_s17 = scalar_lea.hbm %s2760_s0, 4096  ;;  %p1897_p9 = scmp.lt.u32.totalorder %s2166_s28, %s2760_s0 }
  0x39   : > { %p1894_p5 = pnand %p1893_p3, %p1892_p0  ;;  %p1898_p1 = scmp.lt.u32.totalorder %s1896_s17, %s1891_s14 }
  0x3a   : > { %p1900_p4 = scmp.lt.u32.totalorder %s1891_s14, %s2166_s28 }
  0x3b   : > { %p1895_p7 = pneg %p1894_p5  ;;  %p1899_p2 = por %p1898_p1, %p1897_p9 }
  0x3d   : > { %p1901_p6 = por %p1900_p4, %p1899_p2 }
  0x3f   : > { %p1902_p8 = pnand %p1901_p6, %p1895_p7 }
  0x41   : > { %1905 = shalt.err (!%p1902_p8)
}
  0x42   : > { %s1906_s11 = scalar_lea.vmem %s2168_s10, 2048  ;;  %s2012_s19 = smov [#allocation5]  }
  0x43   : > { %p1907_p12 = scmp.ne.s32.totalorder %s2168_s10, %s1906_s11  ;;  %s1911_s27 = sshll.u32 %s2012_s19, 4  ;;  %s1912_s27 = int_to_ptr.vmem [resolvable:$false] %s1911_s27 }
  0x44   : > { %s1913_s15 = scalar_lea.vmem %s1912_s27, 4096  ;;  %p1914_p5 = scmp.lt.s32.totalorder %s2168_s10, %s1912_s27 }
  0x45   : > { %p1909_p11 = pnand %p1907_p12, %p1893_p3  ;;  %p1915_p9 = scmp.lt.s32.totalorder %s1913_s15, %s1906_s11 }
  0x47   : > { %p1910_p0 = pneg %p1909_p11  ;;  %p1916_p1 = por %p1915_p9, %p1914_p5 }
  0x49   : > { %p1917_p2 = pnand %p1916_p1, %p1910_p0 }
  0x4b   : > { %1920 = shalt.err (!%p1917_p2)
}
  0x4c   : > { %s2801_s14 = smov 4   ;;  %s2802_s17 = smov 64  }
  0x4d   : > { %1644 = dma.hbm_to_vmem [thread:$0]  (!%p2172_p13), %s2166_s28, 2048, %s2168_s10, %s2176_s16, %s2802_s17, %s2802_s17, %s2801_s14  }
  0x4e   : > { %p2803_p3 = scmp.ne.s32.totalorder %s2795_s9, 0 }
  0x50   : > { %289 = sbr.rel (%p2803_p3) target bundleno = 837 (0x345), region = 36 }
  0x57   : > { %s2210_s30 = sand.u32 1, %s1991_s22   ;;  %p2804_p7 = scmp.ne.s32.totalorder %s2793_s7, 0 }
  0x58   : > { %s1509_s11 = sshll.u32 %s2210_s30, 7  ;;  %s292_s19 = scalar_lea.sflag [#allocation6], %s2210_s30 }
  0x59   : > { %s2214_s27 = scalar_lea.vmem [#allocation5], %s1509_s11 }
  0x5a   : > { %1974 = dma.done.wait (%p2804_p7), %s292_s19, 2048  }
  0x5b   : > { %1976 = vsyncadd (%p2804_p7), %s292_s19, 4294965248  ;;  %p2805_p13 = scmp.ne.s32.totalorder %s2791_s29, 0 }
  0x5d   : > { %1978 = dma.done.wait (%p2805_p13), [#allocation9], 1024  }
  0x5e   : > { %1980 = vsyncadd (%p2805_p13), [#allocation9], 4294966272  ;;  %v1709_v0 = vld [vmem:[#allocation8] sm:$0xff]   ;;  %v1710_v1 = vld [vmem:[#allocation8 + $0x8] sm:$0xff]   ;;  %vm360_vm0 = vcmask 0   ;;  %p341_p4 = scmp.lt.s32.totalorder %s1999_s24, 1 }
  0x5f   : > { %1565 = vmatprep.subr.bf16.mxu0 %v1709_v0  ;;  %1613 = vmatprep.subr.bf16.mxu1 %v1709_v0  ;;  %v1711_v2 = vld [vmem:[#allocation8 + $0x10] sm:$0xff]   ;;  %v1712_v3 = vld [vmem:[#allocation8 + $0x18] sm:$0xff]   ;;  %v1717_v4 = vld [vmem:[%s2214_s27] sm:$0xff]   ;;  %vm1005_vm1 = vcmask 7168   ;;  %s1537_s19 = sshll.u32 %s1999_s24, 4 }
  0x60   : > { %1566 = vmatpush3.bf16.msra.mxu0 %v1709_v0  ;;  %1621 = vmatpush3.bf16.msra.mxu1 %v1709_v0  ;;  %v1718_v5 = vld [vmem:[%s2214_s27 + $0x40] sm:$0xff]   ;;  %v1714_v7 = vld [vmem:[#allocation8 + $0x28] sm:$0xff]   ;;  %v1715_v8 = vld [vmem:[#allocation8 + $0x30] sm:$0xff]   ;;  %s2543_s10 = scalar_select %p341_p4, %s1999_s24, 1 }
  0x61   : > { %1567 = vmatprep.subr.bf16.mxu0 %v1710_v1  ;;  %1614 = vmatprep.subr.bf16.mxu1 %v1710_v1  ;;  %v1713_v6 = vld [vmem:[#allocation8 + $0x20] sm:$0xff]   ;;  %v1716_v9 = vld [vmem:[#allocation8 + $0x38] sm:$0xff]   ;;  %v1719_v10 = vld [vmem:[%s2214_s27 + $0x8] sm:$0xff]   ;;  %s2711_s28 = scalar_lea.hbm %s2766_s6, %s1537_s19  ;;  %s2016_s24 = smov [#allocation10]  }
  0x62   : > { %1581 = vmatprep.mubr.bf16.mxu0 %v1717_v4  ;;  %1597 = vmatprep.mubr.bf16.mxu1 %v1718_v5  ;;  %v1720_v11 = vld [vmem:[%s2214_s27 + $0x48] sm:$0xff]   ;;  %v1721_v12 = vld [vmem:[%s2214_s27 + $0x10] sm:$0xff]   ;;  %v1722_v14 = vld [vmem:[%s2214_s27 + $0x18] sm:$0xff]   ;;  %s343_s15 = scalar_lea.vmem %s2764_s4, %s2543_s10  ;;  %s350_s11 = scalar_lea.vmem %s2765_s5, %s2543_s10 }
  0x63   : > { %v1723_v13 = vld [vmem:[%s2214_s27 + $0x50] sm:$0xff]   ;;  %v1724_v15 = vld [vmem:[%s2214_s27 + $0x58] sm:$0xff]   ;;  %v1725_v16 = vld [vmem:[%s2214_s27 + $0x20] sm:$0xff]   ;;  %s1341_s10 = scalar_lea.sflag [#allocation7], %s2210_s30  ;;  %s1925_s16 = sshll.u32 %s2016_s24, 4  ;;  %s1926_s16 = int_to_ptr.vmem [resolvable:$false] %s1925_s16 }
  0x64   : > { %1568 = vmatpush3.bf16.msra.mxu0 %v1710_v1  ;;  %1622 = vmatpush3.bf16.msra.mxu1 %v1710_v1  ;;  %v1727_v17 = vld [vmem:[%s2214_s27 + $0x60] sm:$0xff]   ;;  %v1726_v18 = vld [vmem:[%s2214_s27 + $0x28] sm:$0xff]   ;;  %v1729_v20 = vld [vmem:[%s2214_s27 + $0x30] sm:$0xff]  }
  0x65   : > { %1569 = vmatprep.subr.bf16.mxu0 %v1711_v2  ;;  %1615 = vmatprep.subr.bf16.mxu1 %v1711_v2  ;;  %v1728_v19 = vld [vmem:[%s2214_s27 + $0x68] sm:$0xff]   ;;  %v1731_v21 = vld [vmem:[%s2214_s27 + $0x70] sm:$0xff]   ;;  %v1730_v22 = vld [vmem:[%s2214_s27 + $0x38] sm:$0xff]  }
  0x66   : > { %v1732_v23 = vld [vmem:[%s2214_s27 + $0x78] sm:$0xff]   ;;  %s336_s27 = scalar_lea.vmem [#allocation10], %s2210_s30 }
  0x67   : > { %v2243_v24 = vld [vmem:[%s2762_s2] ss:$0 sm:$0xff]  ;;  %s1365_s29 = sshll.u32 %s336_s27, 4  ;;  %s2713_s29 = int_to_ptr.vmem [resolvable:$true] %s1365_s29 }
  0x68   : > { %1570 = vmatpush3.bf16.msra.mxu0 %v1711_v2  ;;  %1623 = vmatpush3.bf16.msra.mxu1 %v1711_v2  ;;  %v2256_v48 = vld [vmem:[%s2763_s3] ss:$0 sm:$0xff]  ;;  %s1921_s18 = scalar_lea.vmem %s2713_s29, 16  ;;  %p1928_p11 = scmp.lt.s32.totalorder %s2713_s29, %s1926_s16 }
  0x69   : > { %1571 = vmatprep.subr.bf16.mxu0 %v1712_v3  ;;  %1616 = vmatprep.subr.bf16.mxu1 %v1712_v3  ;;  %p1922_p6 = scmp.ne.s32.totalorder %s2713_s29, %s1921_s18 }
  0x6b   : > { %p1923_p8 = pnand %p1922_p6, %p2151_p10 }
  0x6c   : > { %1572 = vmatpush3.bf16.msra.mxu0 %v1712_v3  ;;  %1624 = vmatpush3.bf16.msra.mxu1 %v1712_v3 }
  0x6d   : > { %1573 = vmatprep.subr.bf16.mxu0 %v1713_v6  ;;  %1617 = vmatprep.subr.bf16.mxu1 %v1713_v6  ;;  %p1924_p12 = pneg %p1923_p8 }
  0x70   : > { %1574 = vmatpush3.bf16.msra.mxu0 %v1713_v6  ;;  %1625 = vmatpush3.bf16.msra.mxu1 %v1713_v6 }
  0x71   : > { %1575 = vmatprep.subr.bf16.mxu0 %v1714_v7  ;;  %1618 = vmatprep.subr.bf16.mxu1 %v1714_v7 }
  0x74   : > { %1576 = vmatpush3.bf16.msra.mxu0 %v1714_v7  ;;  %1626 = vmatpush3.bf16.msra.mxu1 %v1714_v7 }
  0x75   : > { %1577 = vmatprep.subr.bf16.mxu0 %v1715_v8  ;;  %1619 = vmatprep.subr.bf16.mxu1 %v1715_v8 }
  0x78   : > { %1578 = vmatpush3.bf16.msra.mxu0 %v1715_v8  ;;  %1627 = vmatpush3.bf16.msra.mxu1 %v1715_v8 }
  0x79   : > { %1579 = vmatprep.subr.bf16.mxu0 %v1716_v9  ;;  %1620 = vmatprep.subr.bf16.mxu1 %v1716_v9 }
  0x7c   : > { %1580 = vmatpush3.bf16.msra.mxu0 %v1716_v9  ;;  %1628 = vmatpush3.bf16.msra.mxu1 %v1716_v9 }
  0x7f   : > { %1582 = vmatmul.mubr.bf16.vlgmr.msra.gmra.mrb[0].mxu0 %v1719_v10  ;;  %1598 = vmatmul.mubr.bf16.vlgmr.msra.gmra.mrb[0].mxu1 %v1720_v11 }
  0x80   : > { %1585 = vmatprep.mubr.bf16.mxu0 %v1721_v12  ;;  %1601 = vmatprep.mubr.bf16.mxu1 %v1723_v13 }
  0x87   : > { %1586 = vmatmul.mubr.bf16.gmra.mrb[4].mxu0 %v1722_v14  ;;  %1602 = vmatmul.mubr.bf16.gmra.mrb[4].mxu1 %v1724_v15 }
  0x88   : > { %1589 = vmatprep.mubr.bf16.mxu0 %v1725_v16  ;;  %1605 = vmatprep.mubr.bf16.mxu1 %v1727_v17 }
  0x8f   : > { %1590 = vmatmul.mubr.bf16.gmra.mrb[8].mxu0 %v1726_v18  ;;  %1606 = vmatmul.mubr.bf16.gmra.mrb[8].mxu1 %v1728_v19 }
  0x90   : > { %1593 = vmatprep.mubr.bf16.mxu0 %v1729_v20  ;;  %1609 = vmatprep.mubr.bf16.mxu1 %v1731_v21 }
  0x97   : > { %1594 = vmatmul.mubr.bf16.gmra.mrb[12].mxu0 %v1730_v22  ;;  %1610 = vmatmul.mubr.bf16.gmra.mrb[12].mxu1 %v1732_v23 }
 0x152   : > { %v1583_v25 = vpop.f32.mrb[0].mxu0  ;;  %v1599_v26 = vpop.f32.mrb[0].mxu1 }
 0x153   : > { %v607_v27 = vadd.f32 %v1583_v25, %v2243_v24  ;;  %v671_v28 = vadd.f32 %v1599_v26, %v2243_v24  ;;  %v598_v29 = vpop.f32.mrb[1].mxu0  ;;  %v662_v30 = vpop.f32.mrb[1].mxu1 }
 0x154   : > { %v599_v31 = vadd.f32 %v2243_v24, %v598_v29  ;;  %v1584_v32 = vpop.f32.mrb[2].mxu0  ;;  %v1600_v33 = vpop.f32.mrb[2].mxu1  ;;  %v663_v38 = vadd.f32 %v2243_v24, %v662_v30 }
 0x155   : > { %1733 = vtanh.f32 %v607_v27  ;;  %v610_v34 = vadd.f32 %v1584_v32, %v2243_v24  ;;  %v601_v35 = vpop.f32.mrb[3].mxu0  ;;  %v665_v36 = vpop.f32.mrb[3].mxu1  ;;  %v674_v37 = vadd.f32 %v1600_v33, %v2243_v24 }
 0x156   : > { %1735 = vtanh.f32 %v671_v28  ;;  %v666_v41 = vadd.f32 %v2243_v24, %v665_v36  ;;  %v602_v44 = vadd.f32 %v2243_v24, %v601_v35 }
 0x157   : > { %1737 = vtanh.f32 %v599_v31 }
 0x158   : > { %1739 = vtanh.f32 %v610_v34 }
 0x159   : > { %1741 = vtanh.f32 %v674_v37 }
 0x15a   : > { %v1587_v39 = vpop.f32.mrb[4].mxu0  ;;  %v1603_v40 = vpop.f32.mrb[4].mxu1  ;;  %1743 = vtanh.f32 %v663_v38 }
 0x15b   : > { %v614_v42 = vpop.f32.mrb[5].mxu0  ;;  %v678_v43 = vpop.f32.mrb[5].mxu1  ;;  %1745 = vtanh.f32 %v666_v41  ;;  %v623_v53 = vadd.f32 %v1587_v39, %v2243_v24  ;;  %v687_v63 = vadd.f32 %v1603_v40, %v2243_v24 }
 0x15c   : > { %v1588_v45 = vpop.f32.mrb[6].mxu0  ;;  %v1604_v46 = vpop.f32.mrb[6].mxu1  ;;  %1747 = vtanh.f32 %v602_v44  ;;  %v615_v9 = vadd.f32 %v2243_v24, %v614_v42  ;;  %v679_v19 = vadd.f32 %v2243_v24, %v678_v43 }
 0x15d   : > { %v617_v47 = vpop.f32.mrb[7].mxu0  ;;  %v681_v49 = vpop.f32.mrb[7].mxu1  ;;  %v626_v51 = vadd.f32 %v1588_v45, %v2243_v24  ;;  %v690_v60 = vadd.f32 %v1604_v46, %v2243_v24 }
 0x15e   : > { %v618_v8 = vadd.f32 %v2243_v24, %v617_v47  ;;  %v682_v16 = vadd.f32 %v2243_v24, %v681_v49 }
 0x15f   : > { %v2258_v50 = vpop.eup %1733  ;;  %1749 = vtanh.f32 %v626_v51 }
 0x160   : > { %v2261_v52 = vpop.eup %1735  ;;  %v765_v54 = vmul.f32 %v2258_v50, %v2256_v48  ;;  %1751 = vtanh.f32 %v623_v53 }
 0x161   : > { %2806 = vst [vmem:[#allocation14_spill] sm:$0xff] %v2261_v52  ;;  %v781_v55 = vmul.f32 %v2261_v52, %v2256_v48  ;;  %v2268_v56 = vpop.eup %1737  ;;  %1753 = vtanh.f32 %v690_v60 }
 0x162   : > { %799 = vadd.xlane.f32.xlu1 %v765_v54  ;;  %v1591_v57 = vpop.f32.mrb[8].mxu0  ;;  %v1607_v58 = vpop.f32.mrb[8].mxu1  ;;  %v763_v4 = vmul.f32 %v2268_v56, %v2256_v48  ;;  %1755 = vtanh.f32 %v687_v63 }
 0x163   : > { %v2270_v59 = vpop.eup %1739  ;;  %831 = vadd.xlane.f32.xlu0 %v781_v55  ;;  %v2273_v61 = vpop.f32.mrb[9].mxu0  ;;  %1757 = vtanh.f32 %v618_v8  ;;  %v639_v30 = vadd.f32 %v1591_v57, %v2243_v24  ;;  %v703_v36 = vadd.f32 %v1607_v58, %v2243_v24 }
 0x164   : > { %v2275_v62 = vpop.f32.mrb[9].mxu1  ;;  %v766_v0 = vmul.f32 %v2270_v59, %v2256_v48  ;;  %v1592_v1 = vpop.f32.mrb[10].mxu0  ;;  %1759 = vtanh.f32 %v615_v9  ;;  %v631_v42 = vadd.f32 %v2243_v24, %v2273_v61 }
 0x165   : > { %v1608_v2 = vpop.f32.mrb[10].mxu1  ;;  %v2280_v3 = vpop.eup %1741  ;;  %1761 = vtanh.f32 %v682_v16  ;;  %v642_v29 = vadd.f32 %v1592_v1, %v2243_v24  ;;  %v695_v49 = vadd.f32 %v2243_v24, %v2275_v62 }
 0x166   : > { %2807 = vst [vmem:[#allocation15_spill] sm:$0xff] %v2280_v3  ;;  %v633_v5 = vpop.f32.mrb[11].mxu0  ;;  %v697_v6 = vpop.f32.mrb[11].mxu1  ;;  %801 = vadd.xlane.f32.xlu1 %v766_v0  ;;  %v782_v10 = vmul.f32 %v2280_v3, %v2256_v48  ;;  %1763 = vtanh.f32 %v679_v19  ;;  %v706_v35 = vadd.f32 %v1608_v2, %v2243_v24 }
 0x167   : > { %v2284_v7 = vpop.eup %1743  ;;  %795 = vadd.xlane.f32.xlu0 %v763_v4  ;;  %1765 = vtanh.f32 %v642_v29  ;;  %v634_v41 = vadd.f32 %v2243_v24, %v633_v5  ;;  %v698_v47 = vadd.f32 %v2243_v24, %v697_v6 }
 0x168   : > { %2808 = vst [vmem:[#allocation16_spill] sm:$0xff] %v2284_v7  ;;  %v2290_v11 = vpop.eup %1745  ;;  %v779_v12 = vmul.f32 %v2284_v7, %v2256_v48  ;;  %1767 = vtanh.f32 %v639_v30 }
 0x169   : > { %2809 = vst [vmem:[#allocation17_spill] sm:$0xff] %v2290_v11  ;;  %v2294_v13 = vpop.eup %1747  ;;  %v780_v20 = vmul.f32 %v2290_v11, %v2256_v48  ;;  %1769 = vtanh.f32 %v706_v35  ;;  %v902_v11 = vlaneseq }
 0x16a   : > { %833 = vadd.xlane.f32.xlu1 %v782_v10  ;;  %v1595_v14 = vpop.f32.mrb[12].mxu0  ;;  %v2296_v15 = vpop.f32.mrb[12].mxu1  ;;  %v764_v25 = vmul.f32 %v2294_v13, %v2256_v48  ;;  %1771 = vtanh.f32 %v703_v36 }
 0x16b   : > { %827 = vadd.xlane.f32.xlu0 %v779_v12  ;;  %v2299_v17 = vpop.f32.mrb[13].mxu0  ;;  %v2301_v18 = vpop.f32.mrb[13].mxu1  ;;  %1773 = vtanh.f32 %v634_v41  ;;  %v655_v58 = vadd.f32 %v1595_v14, %v2243_v24  ;;  %v719_v19 = vadd.f32 %v2296_v15, %v2243_v24 }
 0x16c   : > { %v1596_v21 = vpop.f32.mrb[14].mxu0  ;;  %v2306_v22 = vpop.f32.mrb[14].mxu1  ;;  %1775 = vtanh.f32 %v631_v42  ;;  %v647_v1 = vadd.f32 %v2243_v24, %v2299_v17  ;;  %v711_v9 = vadd.f32 %v2243_v24, %v2301_v18  ;;  %v2013_v42 = vmov -inf  }
 0x16d   : > { %v2308_v23 = vpop.eup %1749  ;;  %v649_v26 = vpop.f32.mrb[15].mxu0  ;;  %1777 = vtanh.f32 %v698_v47  ;;  %v658_v57 = vadd.f32 %v1596_v21, %v2243_v24  ;;  %v722_v17 = vadd.f32 %v2306_v22, %v2243_v24  ;;  %361 = vst.msk [vmem:[#allocation2] sm:$0x1] %vm360_vm0, %v2013_v42 }
 0x16e   : > { %v2312_v27 = vpop.f32.mrb[15].mxu1  ;;  %v2314_v28 = vpop.eup %1751  ;;  %829 = vadd.xlane.f32.xlu1 %v780_v20  ;;  %v770_v31 = vmul.f32 %v2308_v23, %v2256_v48  ;;  %1779 = vtanh.f32 %v695_v49  ;;  %v650_v0 = vadd.f32 %v2243_v24, %v649_v26 }
 0x16f   : > { %797 = vadd.xlane.f32.xlu0 %v764_v25  ;;  %v2320_v32 = vpop.eup %1753  ;;  %v769_v33 = vmul.f32 %v2314_v28, %v2256_v48  ;;  %1781 = vtanh.f32 %v658_v57  ;;  %v714_v8 = vadd.f32 %v2243_v24, %v2312_v27 }
 0x170   : > { %2810 = vst [vmem:[#allocation18_spill] sm:$0xff] %v2320_v32  ;;  %v2324_v34 = vpop.eup %1755  ;;  %v786_v37 = vmul.f32 %v2320_v32, %v2256_v48  ;;  %1783 = vtanh.f32 %v655_v58 }
 0x171   : > { %2811 = vst [vmem:[#allocation19_spill] sm:$0xff] %v2324_v34  ;;  %v2330_v38 = vpop.eup %1757  ;;  %v785_v39 = vmul.f32 %v2324_v34, %v2256_v48  ;;  %1785 = vtanh.f32 %v650_v0 }
 0x172   : > { %809 = vadd.xlane.f32.xlu1 %v770_v31  ;;  %v2334_v40 = vpop.eup %1759  ;;  %v768_v43 = vmul.f32 %v2330_v38, %v2256_v48  ;;  %1787 = vtanh.f32 %v647_v1 }
 0x173   : > { %807 = vadd.xlane.f32.xlu0 %v769_v33  ;;  %v2341_v44 = vpop.eup %1761  ;;  %v767_v45 = vmul.f32 %v2334_v40, %v2256_v48  ;;  %1789 = vtanh.f32 %v714_v8 }
 0x174   : > { %2812 = vst [vmem:[#allocation20_spill] sm:$0xff] %v2341_v44  ;;  %v2345_v46 = vpop.eup %1763  ;;  %v784_v51 = vmul.f32 %v2341_v44, %v2256_v48  ;;  %1791 = vtanh.f32 %v711_v9 }
 0x175   : > { %2813 = vst [vmem:[#allocation21_spill] sm:$0xff] %v2345_v46  ;;  %v2352_v53 = vpop.eup %1765  ;;  %v783_v54 = vmul.f32 %v2345_v46, %v2256_v48  ;;  %1793 = vtanh.f32 %v722_v17 }
 0x176   : > { %841 = vadd.xlane.f32.xlu1 %v786_v37  ;;  %v2356_v55 = vpop.eup %1767  ;;  %v774_v60 = vmul.f32 %v2352_v53, %v2256_v48  ;;  %1795 = vtanh.f32 %v719_v19 }
 0x177   : > { %839 = vadd.xlane.f32.xlu0 %v785_v39  ;;  %v2362_v61 = vpop.eup %1769  ;;  %v773_v62 = vmul.f32 %v2356_v55, %v2256_v48 }
 0x178   : > { %2814 = vst [vmem:[#allocation22_spill] sm:$0xff] %v2362_v61  ;;  %v2366_v63 = vpop.eup %1771  ;;  %v790_v2 = vmul.f32 %v2362_v61, %v2256_v48 }
 0x179   : > { %2815 = vst [vmem:[#allocation23_spill] sm:$0xff] %v2366_v63  ;;  %v2373_v4 = vpop.eup %1773  ;;  %v789_v5 = vmul.f32 %v2366_v63, %v2256_v48 }
 0x17a   : > { %805 = vadd.xlane.f32.xlu1 %v768_v43  ;;  %v2377_v6 = vpop.eup %1775  ;;  %v772_v10 = vmul.f32 %v2373_v4, %v2256_v48  ;;  %v2014_v43 = vmov 0.0  }
 0x17b   : > { %803 = vadd.xlane.f32.xlu0 %v767_v45  ;;  %v2385_v12 = vpop.eup %1777  ;;  %v771_v14 = vmul.f32 %v2377_v6, %v2256_v48  ;;  %362 = vst.msk [vmem:[#allocation3] sm:$0x1] %vm360_vm0, %v2014_v43  ;;  %363 = vst [vmem:[#allocation4] sm:$0x1] %v2014_v43 }
 0x17c   : > { %2816 = vst [vmem:[#allocation24_spill] sm:$0xff] %v2385_v12  ;;  %v2389_v16 = vpop.eup %1779  ;;  %v788_v18 = vmul.f32 %v2385_v12, %v2256_v48 }
 0x17d   : > { %2817 = vst [vmem:[#allocation25_spill] sm:$0xff] %v2389_v16  ;;  %v2397_v20 = vpop.eup %1781  ;;  %v787_v21 = vmul.f32 %v2389_v16, %v2256_v48 }
 0x17e   : > { %837 = vadd.xlane.f32.xlu1 %v784_v51  ;;  %2818 = vst [vmem:[#allocation26_spill] sm:$0xff] %v2397_v20  ;;  %v2401_v25 = vpop.eup %1783  ;;  %v778_v22 = vmul.f32 %v2397_v20, %v2256_v48  ;;  %v2529_v20 = vshrl.u32 %v902_v11, 7 }
 0x17f   : > { %835 = vadd.xlane.f32.xlu0 %v783_v54  ;;  %2819 = vst [vmem:[#allocation27_spill] sm:$0xff] %v2401_v25  ;;  %v2405_v26 = vpop.eup %1785  ;;  %v777_v24 = vmul.f32 %v2401_v25, %v2256_v48  ;;  %v2015_v54 = vmov 0  }
 0x180   : > { %v2409_v15 = vpop.eup %1787  ;;  %v776_v27 = vmul.f32 %v2405_v26, %v2256_v48  ;;  %1708 = vset.pattern.permute.xlu1 %v2015_v54  ;;  %1707 = vset.pattern.permute.xlu0 %v2015_v54 }
 0x181   : > { %v2413_v29 = vpop.eup %1789  ;;  %v775_v30 = vmul.f32 %v2409_v15, %v2256_v48 }
 0x182   : > { %817 = vadd.xlane.f32.xlu1 %v774_v60  ;;  %2820 = vst [vmem:[#allocation28_spill] sm:$0xff] %v2413_v29  ;;  %v2417_v31 = vpop.eup %1791  ;;  %v792_v33 = vmul.f32 %v2413_v29, %v2256_v48 }
 0x183   : > { %815 = vadd.xlane.f32.xlu0 %v773_v62  ;;  %2821 = vst [vmem:[#allocation29_spill] sm:$0xff] %v2417_v31  ;;  %v2421_v35 = vpop.eup %1793  ;;  %v791_v36 = vmul.f32 %v2417_v31, %v2256_v48 }
 0x184   : > { %2822 = vst [vmem:[#allocation30_spill] sm:$0xff] %v2421_v35  ;;  %v2425_v37 = vpop.eup %1795  ;;  %v794_v39 = vmul.f32 %v2421_v35, %v2256_v48 }
 0x185   : > { %2823 = vst [vmem:[#allocation31_spill] sm:$0xff] %v2425_v37  ;;  %v793_v41 = vmul.f32 %v2425_v37, %v2256_v48 }
 0x186   : > { %849 = vadd.xlane.f32.xlu1 %v790_v2 }
 0x187   : > { %847 = vadd.xlane.f32.xlu0 %v789_v5 }
 0x18a   : > { %813 = vadd.xlane.f32.xlu1 %v772_v10 }
 0x18b   : > { %811 = vadd.xlane.f32.xlu0 %v771_v14 }
 0x18e   : > { %845 = vadd.xlane.f32.xlu1 %v788_v18 }
 0x18f   : > { %843 = vadd.xlane.f32.xlu0 %v787_v21 }
 0x192   : > { %825 = vadd.xlane.f32.xlu1 %v778_v22 }
 0x193   : > { %823 = vadd.xlane.f32.xlu0 %v777_v24 }
 0x196   : > { %821 = vadd.xlane.f32.xlu1 %v776_v27 }
 0x197   : > { %819 = vadd.xlane.f32.xlu0 %v775_v30 }
 0x19a   : > { %853 = vadd.xlane.f32.xlu1 %v792_v33 }
 0x19b   : > { %851 = vadd.xlane.f32.xlu0 %v791_v36 }
 0x19e   : > { %857 = vadd.xlane.f32.xlu1 %v794_v39 }
 0x19f   : > { %855 = vadd.xlane.f32.xlu0 %v793_v41 }
 0x1ef   : > { %v2433_v45 = vpop.xlane.xlu1 %799 }
 0x1f0   : > { %v2435_v47 = vpop.xlane.xlu0 %831 }
 0x1f3   : > { %v2437_v49 = vpop.xlane.xlu1 %801 }
 0x1f4   : > { %v2439_v51 = vpop.xlane.xlu0 %795 }
 0x1f7   : > { %v2441_v48 = vpop.xlane.xlu1 %833 }
 0x1f8   : > { %v2443_v57 = vpop.xlane.xlu0 %827 }
 0x1fb   : > { %v2445_v58 = vpop.xlane.xlu1 %829 }
 0x1fc   : > { %v2447_v60 = vpop.xlane.xlu0 %797 }
 0x1ff   : > { %v2449_v62 = vpop.xlane.xlu1 %809 }
 0x200   : > { %v2451_v0 = vpop.xlane.xlu0 %807  ;;  %v863_v27 = vmax.f32 %v2437_v49, %v2449_v62 }
 0x201   : > { %v862_v33 = vmax.f32 %v2433_v45, %v2451_v0 }
 0x203   : > { %v2453_v1 = vpop.xlane.xlu1 %841 }
 0x204   : > { %v2455_v2 = vpop.xlane.xlu0 %839 }
 0x207   : > { %v2457_v5 = vpop.xlane.xlu1 %805 }
 0x208   : > { %v2459_v8 = vpop.xlane.xlu0 %803  ;;  %v861_v42 = vmax.f32 %v2447_v60, %v2457_v5 }
 0x209   : > { %v860_v35 = vmax.f32 %v2439_v51, %v2459_v8 }
 0x20b   : > { %v2461_v9 = vpop.xlane.xlu1 %837 }
 0x20c   : > { %v2463_v10 = vpop.xlane.xlu0 %835 }
 0x20f   : > { %v2465_v14 = vpop.xlane.xlu1 %817 }
 0x210   : > { %v2467_v17 = vpop.xlane.xlu0 %815  ;;  %v867_v36 = vmax.f32 %v863_v27, %v2465_v14 }
 0x211   : > { %v866_v39 = vmax.f32 %v862_v33, %v2467_v17 }
 0x213   : > { %v2469_v19 = vpop.xlane.xlu1 %849 }
 0x214   : > { %v2471_v18 = vpop.xlane.xlu0 %847 }
 0x217   : > { %v2473_v21 = vpop.xlane.xlu1 %813 }
 0x218   : > { %v2475_v22 = vpop.xlane.xlu0 %811  ;;  %v865_v29 = vmax.f32 %v861_v42, %v2473_v21 }
 0x219   : > { %v864_v33 = vmax.f32 %v860_v35, %v2475_v22 }
 0x21b   : > { %v2477_v24 = vpop.xlane.xlu1 %845 }
 0x21c   : > { %v2481_v30 = vpop.xlane.xlu0 %843 }
 0x21f   : > { %v2487_v41 = vpop.xlane.xlu1 %825 }
 0x220   : > { %v871_v43 = vmax.f32 %v867_v36, %v2487_v41  ;;  %v2492_v54 = vpop.xlane.xlu0 %823 }
 0x221   : > { %v870_v37 = vmax.f32 %v866_v39, %v2492_v54 }
 0x222   : > { %v875_v27 = vmax.f32 %v871_v43, %v2441_v48 }
 0x223   : > { %v874_v31 = vmax.f32 %v870_v37, %v2435_v47  ;;  %v2501_v61 = vpop.xlane.xlu1 %821 }
 0x224   : > { %v869_v63 = vmax.f32 %v865_v29, %v2501_v61  ;;  %v2504_v36 = vpop.xlane.xlu0 %819  ;;  %v879_v39 = vmax.f32 %v875_v27, %v2453_v1 }
 0x225   : > { %v868_v12 = vmax.f32 %v864_v33, %v2504_v36  ;;  %v878_v35 = vmax.f32 %v874_v31, %v2455_v2 }
 0x226   : > { %v873_v16 = vmax.f32 %v869_v63, %v2445_v58  ;;  %v883_v33 = vmax.f32 %v879_v39, %v2469_v19 }
 0x227   : > { %v872_v42 = vmax.f32 %v868_v12, %v2443_v57  ;;  %v2510_v32 = vpop.xlane.xlu1 %853  ;;  %v882_v12 = vmax.f32 %v878_v35, %v2471_v18 }
 0x228   : > { %v877_v37 = vmax.f32 %v873_v16, %v2461_v9  ;;  %v2514_v43 = vpop.xlane.xlu0 %851 }
 0x229   : > { %v876_v29 = vmax.f32 %v872_v42, %v2463_v10 }
 0x22a   : > { %v881_v34 = vmax.f32 %v877_v37, %v2477_v24 }
 0x22b   : > { %v880_v63 = vmax.f32 %v876_v29, %v2481_v30  ;;  %v2520_v44 = vpop.xlane.xlu1 %857 }
 0x22c   : > { %v885_v27 = vmax.f32 %v881_v34, %v2510_v32  ;;  %v887_v31 = vmax.f32 %v883_v33, %v2520_v44  ;;  %v2525_v16 = vpop.xlane.xlu0 %855  ;;  %v2531_v33 = vld [vmem:[#allocation2] sm:$0x1] }
 0x22d   : > { %v884_v46 = vmax.f32 %v880_v63, %v2514_v43  ;;  %v886_v42 = vmax.f32 %v882_v12, %v2525_v16  ;;  %v904_v63 = vsub.s32 0, %v2529_v20 }
 0x22f   : > { %v888_v37 = vmax.f32 %v884_v46, %v885_v27  ;;  %v889_v3 = vmax.f32 %v886_v42, %v887_v31 }
 0x231   : > { %v890_v39 = vmax.f32 %v888_v37, %v889_v3 }
 0x233   : > { %v891_v29 = vrot.slane %v890_v39, 4 }
 0x235   : > { %v892_v52 = vmax.f32 %v890_v39, %v891_v29 }
 0x237   : > { %v893_v7 = vrot.slane %v892_v52, 2 }
 0x239   : > { %v894_v35 = vmax.f32 %v892_v52, %v893_v7 }
 0x23b   : > { %v895_v34 = vrot.slane %v894_v35, 1 }
 0x23d   : > { %v896_v25 = vmax.f32 %v894_v35, %v895_v34 }
 0x23f   : > { %v2536_v12 = vmax.f32 %v2531_v33, %v896_v25 }
 0x241   : > { %v898_v3 = vsub.f32 %v2531_v33, %v2536_v12  ;;  %1320 = vst.msk [vmem:[#allocation2] sm:$0x1] %vm360_vm0, %v2536_v12  ;;  %v2548_v52 = vrot.slane %v2536_v12, %v904_v63 }
 0x243   : > { %v907_v7 = vsub.f32 %v2439_v51, %v2548_v52  ;;  %v908_v11 = vsub.f32 %v2447_v60, %v2548_v52  ;;  %v909_v46 = vsub.f32 %v2433_v45, %v2548_v52  ;;  %v910_v25 = vsub.f32 %v2437_v49, %v2548_v52 }
 0x244   : > { %v911_v31 = vsub.f32 %v2459_v8, %v2548_v52  ;;  %v912_v51 = vsub.f32 %v2457_v5, %v2548_v52  ;;  %v913_v60 = vsub.f32 %v2451_v0, %v2548_v52  ;;  %v916_v45 = vsub.f32 %v2473_v21, %v2548_v52 }
 0x245   : > { %v939_v42 = vmul.f32 1.442695, %v907_v7  ;;  %v941_v37 = vmul.f32 1.442695, %v908_v11  ;;  %v943_v39 = vmul.f32 1.442695, %v909_v46  ;;  %v914_v8 = vsub.f32 %v2449_v62, %v2548_v52 }
 0x246   : > { %v945_v29 = vmul.f32 1.442695, %v910_v25  ;;  %v947_v49 = vmul.f32 1.442695, %v911_v31  ;;  %v949_v35 = vmul.f32 1.442695, %v912_v51  ;;  %v915_v5 = vsub.f32 %v2475_v22, %v2548_v52 }
 0x247   : > { %1797 = vpow2.f32 %v939_v42  ;;  %v951_v34 = vmul.f32 1.442695, %v913_v60  ;;  %v918_v7 = vsub.f32 %v2465_v14, %v2548_v52  ;;  %v957_v0 = vmul.f32 1.442695, %v916_v45 }
 0x248   : > { %v1324_v27 = vld [vmem:[#allocation2] sm:$0x1]  ;;  %1799 = vpow2.f32 %v941_v37  ;;  %v953_v11 = vmul.f32 1.442695, %v914_v8  ;;  %v917_v21 = vsub.f32 %v2467_v17, %v2548_v52  ;;  %v955_v46 = vmul.f32 1.442695, %v915_v5 }
 0x249   : > { %1325 = vst.msk [vmem:[%s343_s15] sm:$0x1] %vm360_vm0, %v1324_v27  ;;  %1801 = vpow2.f32 %v943_v39  ;;  %v920_v62 = vsub.f32 %v2501_v61, %v2548_v52  ;;  %v961_v25 = vmul.f32 1.442695, %v918_v7  ;;  %v919_v42 = vsub.f32 %v2504_v36, %v2548_v52  ;;  %s1927_s15 = scalar_lea.vmem %s1926_s16, 32 }
 0x24a   : > { %1803 = vpow2.f32 %v945_v29  ;;  %v959_v37 = vmul.f32 1.442695, %v917_v21  ;;  %v922_v61 = vsub.f32 %v2487_v41, %v2548_v52  ;;  %v921_v8 = vsub.f32 %v2492_v54, %v2548_v52  ;;  %p1929_p0 = scmp.lt.s32.totalorder %s1927_s15, %s1921_s18 }
 0x24b   : > { %1805 = vpow2.f32 %v947_v49  ;;  %v965_v39 = vmul.f32 1.442695, %v920_v62  ;;  %v963_v36 = vmul.f32 1.442695, %v919_v42  ;;  %v923_v54 = vsub.f32 %v2443_v57, %v2548_v52 }
 0x24c   : > { %1807 = vpow2.f32 %v949_v35  ;;  %v969_v41 = vmul.f32 1.442695, %v922_v61  ;;  %v967_v62 = vmul.f32 1.442695, %v921_v8  ;;  %v925_v57 = vsub.f32 %v2435_v47, %v2548_v52  ;;  %p1930_p5 = por %p1929_p0, %p1928_p11 }
 0x24d   : > { %1809 = vpow2.f32 %v951_v34  ;;  %v924_v34 = vsub.f32 %v2445_v58, %v2548_v52  ;;  %v926_v58 = vsub.f32 %v2441_v48, %v2548_v52  ;;  %v971_v61 = vmul.f32 1.442695, %v923_v54 }
 0x24e   : > { %1811 = vpow2.f32 %v957_v0  ;;  %v928_v48 = vsub.f32 %v2461_v9, %v2548_v52  ;;  %v927_v47 = vsub.f32 %v2463_v10, %v2548_v52  ;;  %v930_v9 = vsub.f32 %v2453_v1, %v2548_v52  ;;  %p1931_p9 = pnand %p1930_p5, %p1924_p12 }
 0x24f   : > { %1813 = vpow2.f32 %v953_v11  ;;  %v929_v10 = vsub.f32 %v2455_v2, %v2548_v52  ;;  %v932_v1 = vsub.f32 %v2477_v24, %v2548_v52  ;;  %v931_v2 = vsub.f32 %v2481_v30, %v2548_v52 }
 0x250   : > { %1815 = vpow2.f32 %v955_v46  ;;  %v934_v24 = vsub.f32 %v2469_v19, %v2548_v52  ;;  %v933_v30 = vsub.f32 %v2471_v18, %v2548_v52  ;;  %v936_v19 = vsub.f32 %v2510_v32, %v2548_v52 }
 0x251   : > { %v1798_v22 = vpop.eup %1797  ;;  %1817 = vpow2.f32 %v961_v25  ;;  %v935_v18 = vsub.f32 %v2514_v43, %v2548_v52  ;;  %v938_v32 = vsub.f32 %v2520_v44, %v2548_v52 }
 0x252   : > { %v1800_v27 = vpop.eup %1799  ;;  %v1006_v14 = vsel %vm1005_vm1, %v1798_v22, 0.0  ;;  %1091 = vperm.xlu0 %1707, %v1798_v22   ;;  %1819 = vpow2.f32 %v959_v37 }
 0x253   : > { %v1802_v31 = vpop.eup %1801  ;;  %v1007_v17 = vsel %vm1005_vm1, %v1800_v27, 0.0  ;;  %1096 = vperm.xlu1 %1708, %v1800_v27   ;;  %1821 = vpow2.f32 %v965_v39  ;;  %v973_v27 = vmul.f32 1.442695, %v924_v34  ;;  %v977_v39 = vmul.f32 1.442695, %v926_v58 }
 0x254   : > { %v1804_v51 = vpop.eup %1803  ;;  %v1008_v29 = vadd.f32 %v1007_v17, %v1006_v14  ;;  %v1009_v60 = vsel %vm1005_vm1, %v1802_v31, 0.0  ;;  %1823 = vpow2.f32 %v963_v36  ;;  %v981_v34 = vmul.f32 1.442695, %v928_v48 }
 0x255   : > { %v1806_v45 = vpop.eup %1805  ;;  %v1011_v35 = vsel %vm1005_vm1, %v1804_v51, 0.0  ;;  %1825 = vpow2.f32 %v969_v41  ;;  %v995_v43 = vmul.f32 1.442695, %v935_v18  ;;  %v1001_v44 = vmul.f32 1.442695, %v938_v32 }
 0x256   : > { %v1010_v49 = vadd.f32 %v1009_v60, %v1008_v29  ;;  %v1808_v5 = vpop.eup %1807  ;;  %v1013_v11 = vsel %vm1005_vm1, %v1806_v45, 0.0  ;;  %1827 = vpow2.f32 %v967_v62  ;;  %v985_v62 = vmul.f32 1.442695, %v930_v9 }
 0x257   : > { %1101 = vperm.xlu1 %1708, %v1802_v31   ;;  %v1810_v0 = vpop.eup %1809  ;;  %v1015_v25 = vsel %vm1005_vm1, %v1808_v5, 0.0  ;;  %1829 = vpow2.f32 %v973_v27  ;;  %v991_v9 = vmul.f32 1.442695, %v933_v30 }
 0x258   : > { %v1012_v7 = vadd.f32 %v1011_v35, %v1010_v49  ;;  %v1812_v21 = vpop.eup %1811  ;;  %v1017_v42 = vsel %vm1005_vm1, %v1810_v0, 0.0  ;;  %1831 = vpow2.f32 %v971_v61  ;;  %v975_v35 = vmul.f32 1.442695, %v925_v57 }
 0x259   : > { %1136 = vperm.xlu0 %1707, %v1812_v21   ;;  %v1814_v22 = vpop.eup %1813  ;;  %1833 = vpow2.f32 %v977_v39 }
 0x25a   : > { %v1014_v46 = vadd.f32 %v1013_v11, %v1012_v7  ;;  %v2599_v31 = vpop.eup %1815  ;;  %1835 = vpow2.f32 %v975_v35 }
 0x25b   : > { %1106 = vperm.xlu1 %1708, %v1804_v51   ;;  %v1818_v37 = vpop.eup %1817  ;;  %v1019_v51 = vsel %vm1005_vm1, %v1814_v22, 0.0  ;;  %v1021_v49 = vsel %vm1005_vm1, %v2599_v31, 0.0  ;;  %1837 = vpow2.f32 %v981_v34 }
 0x25c   : > { %v1016_v14 = vadd.f32 %v1015_v25, %v1014_v46  ;;  %v2607_v60 = vpop.eup %1819 }
 0x25d   : > { %1146 = vperm.xlu0 %1707, %v1818_v37   ;;  %v1822_v8 = vpop.eup %1821  ;;  %v1025_v11 = vsel %vm1005_vm1, %v2607_v60, 0.0 }
 0x25e   : > { %v1018_v17 = vadd.f32 %v1017_v42, %v1016_v14  ;;  %v2616_v7 = vpop.eup %1823 }
 0x25f   : > { %1111 = vperm.xlu1 %1708, %v1806_v45   ;;  %v1023_v45 = vsel %vm1005_vm1, %v1812_v21, 0.0  ;;  %v1826_v46 = vpop.eup %1825  ;;  %v979_v21 = vmul.f32 1.442695, %v927_v47  ;;  %v1029_v27 = vsel %vm1005_vm1, %v2616_v7, 0.0 }
 0x260   : > { %v1020_v29 = vadd.f32 %v1019_v51, %v1018_v17  ;;  %v1828_v58 = vpop.eup %1827  ;;  %v983_v17 = vmul.f32 1.442695, %v929_v10 }
 0x261   : > { %1156 = vperm.xlu0 %1707, %v1822_v8   ;;  %v1830_v14 = vpop.eup %1829  ;;  %1839 = vpow2.f32 %v979_v21  ;;  %v1033_v51 = vsel %vm1005_vm1, %v1828_v58, 0.0 }
 0x262   : > { %v1022_v36 = vadd.f32 %v1021_v49, %v1020_v29  ;;  %1841 = vpow2.f32 %v985_v62  ;;  %v1832_v61 = vpop.eup %1831  ;;  %v987_v29 = vmul.f32 1.442695, %v931_v2  ;;  %v1035_v49 = vsel %vm1005_vm1, %v1826_v46, 0.0 }
 0x263   : > { %1116 = vperm.xlu1 %1708, %v1808_v5   ;;  %v1027_v5 = vsel %vm1005_vm1, %v1818_v37, 0.0  ;;  %v1031_v37 = vsel %vm1005_vm1, %v1822_v8, 0.0  ;;  %v1834_v48 = vpop.eup %1833  ;;  %1843 = vpow2.f32 %v983_v17  ;;  %v1037_v47 = vsel %vm1005_vm1, %v1832_v61, 0.0 }
 0x264   : > { %v1024_v41 = vadd.f32 %v1023_v45, %v1022_v36  ;;  %v1836_v36 = vpop.eup %1835  ;;  %v1039_v34 = vsel %vm1005_vm1, %v1830_v14, 0.0  ;;  %v1043_v21 = vsel %vm1005_vm1, %v1834_v48, 0.0 }
 0x265   : > { %1166 = vperm.xlu0 %1707, %v1826_v46   ;;  %v1838_v35 = vpop.eup %1837  ;;  %v1041_v46 = vsel %vm1005_vm1, %v1836_v36, 0.0 }
 0x266   : > { %v1026_v54 = vadd.f32 %v1025_v11, %v1024_v41 }
 0x267   : > { %1121 = vperm.xlu1 %1708, %v1810_v0   ;;  %v989_v0 = vmul.f32 1.442695, %v932_v1 }
 0x268   : > { %v1028_v25 = vadd.f32 %v1027_v5, %v1026_v54 }
 0x269   : > { %1176 = vperm.xlu0 %1707, %v1830_v14   ;;  %1845 = vpow2.f32 %v989_v0  ;;  %v1047_v14 = vsel %vm1005_vm1, %v1838_v35, 0.0 }
 0x26a   : > { %v1030_v42 = vadd.f32 %v1029_v27, %v1028_v25  ;;  %1847 = vpow2.f32 %v987_v29 }
 0x26b   : > { %1126 = vperm.xlu1 %1708, %v1814_v22   ;;  %v993_v22 = vmul.f32 1.442695, %v934_v24  ;;  %v1840_v11 = vpop.eup %1839 }
 0x26c   : > { %v1032_v57 = vadd.f32 %v1031_v37, %v1030_v42  ;;  %v1842_v54 = vpop.eup %1841  ;;  %v1045_v62 = vsel %vm1005_vm1, %v1840_v11, 0.0 }
 0x26d   : > { %1186 = vperm.xlu0 %1707, %v1834_v48   ;;  %1849 = vpow2.f32 %v993_v22  ;;  %v1844_v1 = vpop.eup %1843  ;;  %v1051_v37 = vsel %vm1005_vm1, %v1842_v54, 0.0 }
 0x26e   : > { %v1034_v39 = vadd.f32 %v1033_v51, %v1032_v57  ;;  %1851 = vpow2.f32 %v991_v9  ;;  %v1049_v17 = vsel %vm1005_vm1, %v1844_v1, 0.0 }
 0x26f   : > { %1131 = vperm.xlu1 %1708, %v2599_v31   ;;  %v997_v31 = vmul.f32 1.442695, %v936_v19 }
 0x270   : > { %v1036_v8 = vadd.f32 %v1035_v49, %v1034_v39 }
 0x271   : > { %1196 = vperm.xlu0 %1707, %v1838_v35   ;;  %1853 = vpow2.f32 %v997_v31 }
 0x272   : > { %v1038_v45 = vadd.f32 %v1037_v47, %v1036_v8  ;;  %1855 = vpow2.f32 %v995_v43 }
 0x273   : > { %1141 = vperm.xlu1 %1708, %v2607_v60   ;;  %v937_v60 = vsub.f32 %v2525_v16, %v2548_v52  ;;  %v1846_v25 = vpop.eup %1845  ;;  %1857 = vpow2.f32 %v1001_v44 }
 0x274   : > { %v1040_v41 = vadd.f32 %v1039_v34, %v1038_v45  ;;  %v899_v45 = vmul.f32 1.442695, %v898_v3  ;;  %v1003_v3 = vld [vmem:[#allocation3] sm:$0x1] }
 0x275   : > { %1206 = vperm.xlu0 %1707, %v1842_v54   ;;  %v999_v42 = vmul.f32 1.442695, %v937_v60 }
 0x276   : > { %v1042_v10 = vadd.f32 %v1041_v46, %v1040_v41 }
 0x277   : > { %1151 = vperm.xlu1 %1708, %v2616_v7   ;;  %v1848_v7 = vpop.eup %1847  ;;  %1859 = vpow2.f32 %v999_v42 }
 0x278   : > { %v1044_v5 = vadd.f32 %v1043_v21, %v1042_v10  ;;  %v1850_v16 = vpop.eup %1849  ;;  %v1053_v57 = vsel %vm1005_vm1, %v1848_v7, 0.0  ;;  %1861 = vpow2.f32 %v899_v45 }
 0x279   : > { %1216 = vperm.xlu0 %1707, %v1846_v25   ;;  %v1852_v0 = vpop.eup %1851  ;;  %v1059_v22 = vsel %vm1005_vm1, %v1850_v16, 0.0 }
 0x27a   : > { %v1046_v27 = vadd.f32 %v1045_v62, %v1044_v5  ;;  %v1057_v29 = vsel %vm1005_vm1, %v1852_v0, 0.0 }
 0x27b   : > { %1161 = vperm.xlu1 %1708, %v1828_v58   ;;  %v1854_v51 = vpop.eup %1853  ;;  %v1055_v58 = vsel %vm1005_vm1, %v1846_v25, 0.0 }
 0x27c   : > { %v1048_v2 = vadd.f32 %v1047_v14, %v1046_v27  ;;  %v1856_v30 = vpop.eup %1855 }
 0x27d   : > { %1226 = vperm.xlu0 %1707, %v1850_v16   ;;  %v1858_v49 = vpop.eup %1857  ;;  %v1061_v8 = vsel %vm1005_vm1, %v1856_v30, 0.0 }
 0x27e   : > { %v1050_v52 = vadd.f32 %v1049_v17, %v1048_v2  ;;  %v1067_v32 = vsel %vm1005_vm1, %v1858_v49, 0.0 }
 0x27f   : > { %1171 = vperm.xlu1 %1708, %v1832_v61  }
 0x280   : > { %v1052_v24 = vadd.f32 %v1051_v37, %v1050_v52 }
 0x281   : > { %1236 = vperm.xlu0 %1707, %v1854_v51   ;;  %v1860_v47 = vpop.eup %1859 }
 0x282   : > { %v1054_v48 = vadd.f32 %v1053_v57, %v1052_v24  ;;  %v1065_v9 = vsel %vm1005_vm1, %v1860_v47, 0.0  ;;  %v1862_v12 = vpop.eup %1861 }
 0x283   : > { %1181 = vperm.xlu1 %1708, %v1836_v36   ;;  %v1063_v36 = vsel %vm1005_vm1, %v1854_v51, 0.0  ;;  %v1004_v43 = vmul.f32 %v1862_v12, %v1003_v3 }
 0x284   : > { %v1056_v39 = vadd.f32 %v1055_v58, %v1054_v48 }
 0x285   : > { %1246 = vperm.xlu0 %1707, %v1858_v49  }
 0x286   : > { %v1058_v19 = vadd.f32 %v1057_v29, %v1056_v39 }
 0x287   : > { %1191 = vperm.xlu1 %1708, %v1840_v11  }
 0x288   : > { %v1060_v61 = vadd.f32 %v1059_v22, %v1058_v19 }
 0x28a   : > { %v1062_v35 = vadd.f32 %v1061_v8, %v1060_v61 }
 0x28b   : > { %1201 = vperm.xlu1 %1708, %v1844_v1  }
 0x28c   : > { %v1064_v18 = vadd.f32 %v1063_v36, %v1062_v35 }
 0x28e   : > { %v1066_v34 = vadd.f32 %v1065_v9, %v1064_v18 }
 0x28f   : > { %1211 = vperm.xlu1 %1708, %v1848_v7  }
 0x290   : > { %v1068_v31 = vadd.f32 %v1067_v32, %v1066_v34  ;;  %v2824_v32 = vld [vmem:[#allocation27_spill] sm:$0xff] }
 0x292   : > { %v1069_v41 = vrot.slane %v1068_v31, 4 }
 0x293   : > { %1221 = vperm.xlu1 %1708, %v1852_v0  }
 0x294   : > { %v1070_v11 = vadd.f32 %v1069_v41, %v1068_v31 }
 0x296   : > { %v1071_v46 = vrot.slane %v1070_v11, 2 }
 0x297   : > { %1231 = vperm.xlu1 %1708, %v1856_v30  }
 0x298   : > { %v1072_v33 = vadd.f32 %v1071_v46, %v1070_v11  ;;  %v2825_v11 = vld [vmem:[#allocation26_spill] sm:$0xff] }
 0x29a   : > { %v1073_v54 = vrot.slane %v1072_v33, 1 }
 0x29b   : > { %1241 = vperm.xlu1 %1708, %v1860_v47  }
 0x29c   : > { %v1074_v10 = vadd.f32 %v1073_v54, %v1072_v33  ;;  %v2827_v54 = vld [vmem:[#allocation17_spill] sm:$0xff] }
 0x29e   : > { %v1075_v21 = vadd.f32 %v1074_v10, %v1004_v43 }
 0x29f   : > { %1081 = vperm.xlu1 %1708, %v1862_v12   ;;  %v2826_v12 = vld [vmem:[#allocation16_spill] sm:$0xff] }
 0x2a0   : > { %1077 = vst.msk [vmem:[#allocation3] sm:$0x1] %vm360_vm0, %v1075_v21 }
 0x2a7   : > { %v1326_v60 = vld [vmem:[#allocation3] sm:$0x1] }
 0x2a8   : > { %1327 = vst.msk [vmem:[%s350_s11] sm:$0x1] %vm360_vm0, %v1326_v60  ;;  %v2828_v60 = vld [vmem:[#allocation14_spill] sm:$0xff] }
 0x2d1   : > { %v1092_v5 = vpop.permute.xlu0 %1091 }
 0x2d2   : > { %v1097_v44 = vpop.permute.xlu1 %1096  ;;  %v1249_v2 = vmul.f32 %v2268_v56, %v1092_v5  ;;  %v2829_v5 = vld [vmem:[#allocation15_spill] sm:$0xff] }
 0x2d3   : > { %v1250_v42 = vmul.f32 %v2294_v13, %v1097_v44 }
 0x2d5   : > { %v1281_v16 = vadd.f32 %v1250_v42, %v1249_v2 }
 0x2d6   : > { %v1102_v1 = vpop.permute.xlu1 %1101 }
 0x2d7   : > { %v1251_v7 = vmul.f32 %v2258_v50, %v1102_v1 }
 0x2d8   : > { %v1137_v62 = vpop.permute.xlu0 %1136 }
 0x2d9   : > { %v1282_v24 = vadd.f32 %v1281_v16, %v1251_v7  ;;  %v2831_v7 = vld [vmem:[#allocation20_spill] sm:$0xff] }
 0x2da   : > { %v1107_v25 = vpop.permute.xlu1 %1106 }
 0x2db   : > { %v1252_v52 = vmul.f32 %v2270_v59, %v1107_v25 }
 0x2dc   : > { %v1147_v27 = vpop.permute.xlu0 %1146 }
 0x2dd   : > { %v1283_v51 = vadd.f32 %v1282_v24, %v1252_v52 }
 0x2de   : > { %v1112_v14 = vpop.permute.xlu1 %1111 }
 0x2df   : > { %v1253_v0 = vmul.f32 %v2334_v40, %v1112_v14  ;;  %v1258_v40 = vmul.f32 %v2373_v4, %v1137_v62 }
 0x2e0   : > { %v1157_v37 = vpop.permute.xlu0 %1156 }
 0x2e1   : > { %v1284_v58 = vadd.f32 %v1283_v51, %v1253_v0  ;;  %v1262_v9 = vmul.f32 %v2405_v26, %v1157_v37  ;;  %v2832_v37 = vld [vmem:[#allocation19_spill] sm:$0xff] }
 0x2e2   : > { %v1117_v17 = vpop.permute.xlu1 %1116 }
 0x2e3   : > { %v1254_v48 = vmul.f32 %v2330_v38, %v1117_v17 }
 0x2e4   : > { %v1167_v13 = vpop.permute.xlu0 %1166 }
 0x2e5   : > { %v1285_v56 = vadd.f32 %v1284_v58, %v1254_v48  ;;  %v1264_v46 = vmul.f32 %v2825_v11, %v1167_v13  ;;  %v2834_v13 = vld [vmem:[#allocation25_spill] sm:$0xff] }
 0x2e6   : > { %v1122_v57 = vpop.permute.xlu1 %1121 }
 0x2e7   : > { %v1255_v39 = vmul.f32 %v2314_v28, %v1122_v57  ;;  %v1260_v28 = vmul.f32 %v2352_v53, %v1147_v27  ;;  %v2830_v27 = vld [vmem:[#allocation21_spill] sm:$0xff]  ;;  %v2833_v57 = vld [vmem:[#allocation18_spill] sm:$0xff] }
 0x2e8   : > { %v1177_v22 = vpop.permute.xlu0 %1176 }
 0x2e9   : > { %v1286_v29 = vadd.f32 %v1285_v56, %v1255_v39  ;;  %v1266_v10 = vmul.f32 %v2827_v54, %v1177_v22 }
 0x2ea   : > { %v1127_v30 = vpop.permute.xlu1 %1126 }
 0x2eb   : > { %v1256_v50 = vmul.f32 %v2308_v23, %v1127_v30 }
 0x2ec   : > { %v1187_v45 = vpop.permute.xlu0 %1186 }
 0x2ed   : > { %v1287_v19 = vadd.f32 %v1286_v29, %v1256_v50  ;;  %v1268_v1 = vmul.f32 %v2829_v5, %v1187_v45  ;;  %v2835_v50 = vld [vmem:[#allocation24_spill] sm:$0xff] }
 0x2ee   : > { %v1132_v49 = vpop.permute.xlu1 %1131 }
 0x2ef   : > { %v1257_v59 = vmul.f32 %v2377_v6, %v1132_v49 }
 0x2f0   : > { %v1197_v41 = vpop.permute.xlu0 %1196 }
 0x2f1   : > { %v1288_v61 = vadd.f32 %v1287_v19, %v1257_v59  ;;  %v1270_v17 = vmul.f32 %v2831_v7, %v1197_v41  ;;  %v2836_v59 = vld [vmem:[#allocation23_spill] sm:$0xff]  ;;  %v2841_v41 = vld [vmem:[#allocation30_spill] sm:$0xff] }
 0x2f2   : > { %v1142_v8 = vpop.permute.xlu1 %1141 }
 0x2f3   : > { %v1259_v38 = vmul.f32 %v2356_v55, %v1142_v8  ;;  %v1289_v47 = vadd.f32 %v1288_v61, %v1258_v40  ;;  %v2837_v8 = vld [vmem:[#allocation22_spill] sm:$0xff] }
 0x2f5   : > { %v1290_v35 = vadd.f32 %v1289_v47, %v1259_v38 }
 0x2f6   : > { %v1152_v36 = vpop.permute.xlu1 %1151 }
 0x2f7   : > { %v1261_v23 = vmul.f32 %v2409_v15, %v1152_v36  ;;  %v1291_v18 = vadd.f32 %v1290_v35, %v1260_v28  ;;  %v1207_v15 = vpop.permute.xlu0 %1206  ;;  %v2838_v35 = vld [vmem:[#allocation29_spill] sm:$0xff] }
 0x2f8   : > { %v1272_v51 = vmul.f32 %v2833_v57, %v1207_v15 }
 0x2f9   : > { %v1292_v34 = vadd.f32 %v1291_v18, %v1261_v23  ;;  %v2839_v23 = vld [vmem:[#allocation28_spill] sm:$0xff] }
 0x2fa   : > { %v1162_v6 = vpop.permute.xlu1 %1161 }
 0x2fb   : > { %v1263_v31 = vmul.f32 %v2824_v32, %v1162_v6  ;;  %v1293_v4 = vadd.f32 %v1292_v34, %v1262_v9  ;;  %v1217_v2 = vpop.permute.xlu0 %1216  ;;  %v2840_v32 = vld [vmem:[#allocation31_spill] sm:$0xff] }
 0x2fc   : > { %v1274_v29 = vmul.f32 %v2835_v50, %v1217_v2 }
 0x2fd   : > { %v1294_v55 = vadd.f32 %v1293_v4, %v1263_v31 }
 0x2fe   : > { %v1172_v33 = vpop.permute.xlu1 %1171 }
 0x2ff   : > { %v1265_v53 = vmul.f32 %v2826_v12, %v1172_v33  ;;  %v1295_v3 = vadd.f32 %v1294_v55, %v1264_v46  ;;  %v1227_v58 = vpop.permute.xlu0 %1226 }
 0x300   : > { %v1276_v38 = vmul.f32 %v2837_v8, %v1227_v58 }
 0x301   : > { %v1296_v43 = vadd.f32 %v1295_v3, %v1265_v53 }
 0x302   : > { %v1182_v21 = vpop.permute.xlu1 %1181 }
 0x303   : > { %v1267_v26 = vmul.f32 %v2828_v60, %v1182_v21  ;;  %v1297_v44 = vadd.f32 %v1296_v43, %v1266_v10  ;;  %v1237_v61 = vpop.permute.xlu0 %1236  ;;  %v1078_v43 = vld [vmem:[#allocation4] sm:$0x1] }
 0x304   : > { %v1278_v18 = vmul.f32 %v2839_v23, %v1237_v61 }
 0x305   : > { %v1298_v62 = vadd.f32 %v1297_v44, %v1267_v26 }
 0x306   : > { %v1192_v25 = vpop.permute.xlu1 %1191 }
 0x307   : > { %v1269_v14 = vmul.f32 %v2830_v27, %v1192_v25  ;;  %v1299_v42 = vadd.f32 %v1298_v62, %v1268_v1  ;;  %v1247_v34 = vpop.permute.xlu0 %1246 }
 0x308   : > { %v1280_v11 = vmul.f32 %v2841_v41, %v1247_v34 }
 0x309   : > { %v1300_v16 = vadd.f32 %v1299_v42, %v1269_v14 }
 0x30a   : > { %v1202_v52 = vpop.permute.xlu1 %1201 }
 0x30b   : > { %v1271_v24 = vmul.f32 %v2832_v37, %v1202_v52  ;;  %v1301_v0 = vadd.f32 %v1300_v16, %v1270_v17 }
 0x30d   : > { %v1302_v48 = vadd.f32 %v1301_v0, %v1271_v24 }
 0x30e   : > { %v1212_v39 = vpop.permute.xlu1 %1211 }
 0x30f   : > { %v1273_v30 = vmul.f32 %v2834_v13, %v1212_v39  ;;  %v1303_v56 = vadd.f32 %v1302_v48, %v1272_v51 }
 0x311   : > { %v1304_v49 = vadd.f32 %v1303_v56, %v1273_v30 }
 0x312   : > { %v1222_v19 = vpop.permute.xlu1 %1221 }
 0x313   : > { %v1275_v22 = vmul.f32 %v2836_v59, %v1222_v19  ;;  %v1305_v40 = vadd.f32 %v1304_v49, %v1274_v29 }
 0x315   : > { %v1306_v47 = vadd.f32 %v1305_v40, %v1275_v22 }
 0x316   : > { %v1232_v28 = vpop.permute.xlu1 %1231 }
 0x317   : > { %v1277_v45 = vmul.f32 %v2838_v35, %v1232_v28  ;;  %v1307_v36 = vadd.f32 %v1306_v47, %v1276_v38 }
 0x319   : > { %v1308_v9 = vadd.f32 %v1307_v36, %v1277_v45 }
 0x31a   : > { %v1242_v6 = vpop.permute.xlu1 %1241 }
 0x31b   : > { %v1279_v31 = vmul.f32 %v2840_v32, %v1242_v6  ;;  %v1309_v4 = vadd.f32 %v1308_v9, %v1278_v18 }
 0x31d   : > { %v1310_v46 = vadd.f32 %v1309_v4, %v1279_v31 }
 0x31e   : > { %v1082_v53 = vpop.permute.xlu1 %1081 }
 0x31f   : > { %v1311_v55 = vadd.f32 %v1310_v46, %v1280_v11  ;;  %v1087_v10 = vrot.slane %v1082_v53, %v904_v63 }
 0x321   : > { %v1312_v33 = vrot.slane %v1311_v55, 4  ;;  %v1088_v60 = vmul.f32 %v1087_v10, %v1078_v43 }
 0x323   : > { %v1313_v12 = vadd.f32 %v1312_v33, %v1311_v55 }
 0x325   : > { %v1314_v3 = vrot.slane %v1313_v12, 2 }
 0x327   : > { %v1315_v54 = vadd.f32 %v1314_v3, %v1313_v12 }
 0x329   : > { %v1316_v15 = vrot.slane %v1315_v54, 1 }
 0x32b   : > { %v1317_v21 = vadd.f32 %v1316_v15, %v1315_v54 }
 0x32d   : > { %v1318_v26 = vadd.f32 %v1317_v21, %v1088_v60 }
 0x32f   : > { %1319 = vst [vmem:[#allocation4] sm:$0x1] %v1318_v26 }
 0x336   : > { %v1328_v20 = vld [vmem:[#allocation4] sm:$0x1] }
 0x337   : > { %1329 = vst [vmem:[%s336_s27] sm:$0x1] %v1328_v20 }
 0x338   : > { %1934 = shalt.err (!%p1931_p9)
}
 0x339   : > { %s1935_s30 = scalar_lea.hbm %s2711_s28, 16  ;;  %s1939_s11 = scalar_lea.hbm %s2766_s6, 32 }
 0x33a   : > { %p1936_p1 = scmp.ne.s32.totalorder %s2711_s28, %s1935_s30  ;;  %p1940_p7 = scmp.lt.u32.totalorder %s2711_s28, %s2766_s6 }
 0x33b   : > { %p1941_p13 = scmp.lt.u32.totalorder %s1939_s11, %s1935_s30  ;;  %p1943_p6 = scmp.lt.u32.totalorder %s1935_s30, %s2711_s28 }
 0x33c   : > { %p1937_p2 = pnand %p1936_p1, %p2151_p10 }
 0x33d   : > { %p1942_p4 = por %p1941_p13, %p1940_p7 }
 0x33e   : > { %p1938_p3 = pneg %p1937_p2 }
 0x33f   : > { %p1944_p8 = por %p1943_p6, %p1942_p4 }
 0x341   : > { %p1945_p12 = pnand %p1944_p8, %p1938_p3 }
 0x343   : > { %1948 = shalt.err (!%p1945_p12)
}
 0x344   : > { %1635 = dma.vmem_to_hbm [thread:$0]  (%p2151_p10), %s2713_s29, 16, %s2711_s28, %s1341_s10  }
 0x345 PF: > { %s1393_s7 = sand.u32 1, %s1987_s21   ;;  %p2842_p11 = scmp.ne.s32.totalorder %s2794_s8, 0 }
 0x346   : > { %p2843_p0 = scmp.ge.s32.totalorder %s2007_s26, 2  ;;  %s1394_s9 = scalar_lea.sflag [#allocation7], %s1393_s7 }
 0x348   : > { %p1646_p5 = pnand %p2843_p0, %p2842_p11 }
 0x34a   : > { %1982 = dma.done.wait (!%p1646_p5), %s1394_s9, 16  }
 0x34b   : > { %1984 = vsyncadd (!%p1646_p5), %s1394_s9, 4294967280  ;;  %s24_s26 = sadd.s32 1, %s2007_s26   ;;  %s2844_s21 = smov %s1991_s22 }
 0x34c   : > { %p21_p9 = scmp.ge.s32.totalorder %s24_s26, 4   ;;  %s2845_s22 = smov %s1995_s23 }
 0x34d   : > { %s2846_s23 = smov %s2160_s20  ;;  %s2847_s24 = smov %s2003_s25 }
 0x34e   : > { %s2848_s25 = smov %s2850_s13  ;;  %23 = sbr.rel (!%p21_p9) target bundleno = 7 (0x7), region = 117 }
 0x355   :  { %1398 = vsyncpa [#allocation6], 1 }
 0x356   :  { %1400 = vsyncpa [#allocation6 + $0x1], 1 }
 0x357   :  { %1401 = vsyncpa [#allocation9], 1 }
 0x358   :  { %1402 = vsyncpa [#allocation7], 1 }
 0x359   :  { %1404 = vsyncpa [#allocation7 + $0x1], 1 }

</bundles_post_ra>
